<compile_context>
chip_gen: v5e
topology: v5e:2x2
jax: 0.10.0
libtpu: 0.0.40
codegen_flags: <defaults>
</compile_context>

<pallas_src>
import math
from functools import partial

import jax
import jax.numpy as jnp
from jax.experimental import pallas as pl
from jax.experimental.pallas import tpu as pltpu


# ----------------------------- shared math helpers ---------------------------

def _layernorm(x, w, b, eps=1e-5):
    """LayerNorm over the last dim, f32 statistics.  Pure jnp -> usable in & out of kernels."""
    x = x.astype(jnp.float32)
    mu = jnp.mean(x, axis=-1, keepdims=True)
    var = jnp.mean(jnp.square(x - mu), axis=-1, keepdims=True)
    return (x - mu) * jax.lax.rsqrt(var + eps) * w + b


def _softmax_lastdim(s):
    """Numerically stable softmax; EUP approx reciprocal instead of a VALU divide."""
    m = jnp.max(s, axis=-1, keepdims=True)
    e = jnp.exp(s - m)
    return e * pl.reciprocal(jnp.sum(e, axis=-1, keepdims=True), approx=True)


def _attention_core(q, k, v, wo, bo, bb, tq, tk, nhead, mask_bias, cdt):
    """Multi-head attention on already-projected Q/K/V (kernel-side only).

    q: (bb*tq, D) f32, k/v: (bb*tk, D) f32, wo: (D, D) pre-transposed out-proj.
    Heads run in a static loop; instead of concatenating head outputs, the output
    projection is accumulated per head:
        out = sum_h softmax(Qh Kh^T / sqrt(hd)) Vh @ Wo[h]   (mathematically identical).
    """
    d = q.shape[-1]
    hd = d // nhead
    scale = 1.0 / math.sqrt(hd)
    q3 = q.reshape(bb, tq, d)
    k3 = k.reshape(bb, tk, d)
    v3 = v.reshape(bb, tk, d)
    out = jnp.zeros((bb * tq, d), jnp.float32)
    for h in range(nhead):                                   # static, fully unrolled
        sl = slice(h * hd, (h + 1) * hd)
        qh = q3[:, :, sl].astype(cdt)
        kh = k3[:, :, sl].astype(cdt)
        vh = v3[:, :, sl].astype(cdt)
        s = jnp.einsum('btd,bsd->bts', qh, kh,
                       preferred_element_type=jnp.float32) * scale
        if mask_bias is not None:
            s = s + mask_bias                                # (bb, 1, tk) over queries
        p = _softmax_lastdim(s)
        ctx = jnp.einsum('bts,bsd->btd', p.astype(cdt), vh,
                         preferred_element_type=jnp.float32)
        out = out + jnp.dot(ctx.reshape(bb * tq, hd).astype(cdt),
                            wo[sl, :].astype(cdt),
                            preferred_element_type=jnp.float32)
    return out + bo


# --------------------------------- kernels ------------------------------------

def encoder_layer_kernel(nhead, cdt,
                         src_ref, pos_ref, kbias_ref,
                         wqk_ref, bqk_ref, wv_ref, bv_ref, wo_ref, bo_ref,
                         w1_ref, b1_ref, w2_ref, b2_ref,
                         ln1w_ref, ln1b_ref, ln2w_ref, ln2b_ref,
                         out_ref):
    bb, s, d = src_ref.shape
    src = src_ref[...].reshape(bb * s, d).astype(jnp.float32)
    pos = pos_ref[...].reshape(bb * s, d).astype(jnp.float32)
    kbias = kbias_ref[...]                                       # (bb, 1, s)

    # --- self attention: q = k = src + pos, v = src  (fused Q|K projection) ---
    qk_in = (src + pos).astype(cdt)
    qk = jnp.dot(qk_in, wqk_ref[...].astype(cdt),
                 preferred_element_type=jnp.float32) + bqk_ref[...]
    v = jnp.dot(src.astype(cdt), wv_ref[...].astype(cdt),
                preferred_element_type=jnp.float32) + bv_ref[...]
    attn = _attention_core(qk[:, :d], qk[:, d:], v, wo_ref[...], bo_ref[...],
                           bb, s, s, nhead, kbias, cdt)
    x = _layernorm(src + attn, ln1w_ref[...], ln1b_ref[...])     # dropout1 == identity

    # --- feed-forward (relu) ---
    hdn = jnp.dot(x.astype(cdt), w1_ref[...].astype(cdt),
                  preferred_element_type=jnp.float32) + b1_ref[...]
    hdn = jnp.maximum(hdn, 0.0)                                  # dropout == identity
    f = jnp.dot(hdn.astype(cdt), w2_ref[...].astype(cdt),
                preferred_element_type=jnp.float32) + b2_ref[...]
    x = _layernorm(x + f, ln2w_ref[...], ln2b_ref[...])          # dropout2 == identity

    out_ref[...] = x.reshape(bb, s, d).astype(out_ref.dtype)


def decoder_layer_kernel(nhead, cdt,
                         tgt_ref, mem_ref, qpos_ref, pos_ref, kbias_ref,
                         sa_wqk_ref, sa_bqk_ref, sa_wv_ref, sa_bv_ref, sa_wo_ref, sa_bo_ref,
                         ca_wq_ref, ca_bq_ref, ca_wk_ref, ca_bk_ref,
                         ca_wv_ref, ca_bv_ref, ca_wo_ref, ca_bo_ref,
                         w1_ref, b1_ref, w2_ref, b2_ref,
                         ln1w_ref, ln1b_ref, ln2w_ref, ln2b_ref, ln3w_ref, ln3b_ref,
                         out_ref):
    bb, t, d = tgt_ref.shape
    s = mem_ref.shape[1]
    tgt = tgt_ref[...].reshape(bb * t, d).astype(jnp.float32)
    qpos = qpos_ref[...].reshape(bb * t, d).astype(jnp.float32)
    mem = mem_ref[...].reshape(bb * s, d).astype(jnp.float32)
    pos = pos_ref[...].reshape(bb * s, d).astype(jnp.float32)
    kbias = kbias_ref[...]                                       # (bb, 1, s)

    # --- self attention: q = k = tgt + query_pos, v = tgt (no mask) ---
    qk_in = (tgt + qpos).astype(cdt)
    qk = jnp.dot(qk_in, sa_wqk_ref[...].astype(cdt),
                 preferred_element_type=jnp.float32) + sa_bqk_ref[...]
    v = jnp.dot(tgt.astype(cdt), sa_wv_ref[...].astype(cdt),
                preferred_element_type=jnp.float32) + sa_bv_ref[...]
    attn = _attention_core(qk[:, :d], qk[:, d:], v, sa_wo_ref[...], sa_bo_ref[...],
                           bb, t, t, nhead, None, cdt)
    x = _layernorm(tgt + attn, ln1w_ref[...], ln1b_ref[...])     # dropout1 == identity

    # --- cross attention: q = x + query_pos, k = memory + pos, v = memory ---
    q = jnp.dot((x + qpos).astype(cdt), ca_wq_ref[...].astype(cdt),
                preferred_element_type=jnp.float32) + ca_bq_ref[...]
    k = jnp.dot((mem + pos).astype(cdt), ca_wk_ref[...].astype(cdt),
                preferred_element_type=jnp.float32) + ca_bk_ref[...]
    v = jnp.dot(mem.astype(cdt), ca_wv_ref[...].astype(cdt),
                preferred_element_type=jnp.float32) + ca_bv_ref[...]
    attn = _attention_core(q, k, v, ca_wo_ref[...], ca_bo_ref[...],
                           bb, t, s, nhead, kbias, cdt)
    x = _layernorm(x + attn, ln2w_ref[...], ln2b_ref[...])       # dropout2 == identity

    # --- feed-forward (relu) ---
    hdn = jnp.dot(x.astype(cdt), w1_ref[...].astype(cdt),
                  preferred_element_type=jnp.float32) + b1_ref[...]
    hdn = jnp.maximum(hdn, 0.0)                                  # dropout == identity
    f = jnp.dot(hdn.astype(cdt), w2_ref[...].astype(cdt),
                preferred_element_type=jnp.float32) + b2_ref[...]
    x = _layernorm(x + f, ln3w_ref[...], ln3b_ref[...])          # dropout3 == identity

    out_ref[...] = x.reshape(bb, t, d).astype(out_ref.dtype)


# ------------------------------ pallas_call plumbing --------------------------

ENC_PARAM_ORDER = ("wqk", "bqk", "wv", "bv", "wo", "bo",
                   "w1", "b1", "w2", "b2", "ln1w", "ln1b", "ln2w", "ln2b")
DEC_PARAM_ORDER = ("sa_wqk", "sa_bqk", "sa_wv", "sa_bv", "sa_wo", "sa_bo",
                   "ca_wq", "ca_bq", "ca_wk", "ca_bk", "ca_wv", "ca_bv", "ca_wo", "ca_bo",
                   "w1", "b1", "w2", "b2",
                   "ln1w", "ln1b", "ln2w", "ln2b", "ln3w", "ln3b")

# Re-derived for v7x's 64 MiB physical VMEM (> default 32 MiB scoped limit, also raises
# v5e's 16 MiB default).  At realistic sizes, shrink the batch block before touching this.
_VMEM_LIMIT_BYTES = 48 * 1024 * 1024

_BUFFERED_SUPPORTED = None


def _buffered_ok():
    """Probe whether pipeline_mode=pl.Buffered(1) (single-buffered grid-invariant inputs)
    works on this jax/libtpu; otherwise fall back to default double-buffering."""
    global _BUFFERED_SUPPORTED
    if _BUFFERED_SUPPORTED is not None:
        return _BUFFERED_SUPPORTED
    try:
        def _k(x_ref, w_ref, o_ref):
            o_ref[...] = x_ref[...] + w_ref[...]
        x = jnp.zeros((8, 128), jnp.float32)
        out = pl.pallas_call(
            _k,
            out_shape=jax.ShapeDtypeStruct((8, 128), jnp.float32),
            grid=(2,),
            in_specs=[pl.BlockSpec((8, 128), lambda i: (0, 0)),
                      pl.BlockSpec((8, 128), lambda i: (0, 0),
                                   pipeline_mode=pl.Buffered(1))],
            out_specs=pl.BlockSpec((8, 128), lambda i: (0, 0)),
        )(x, x)
        jax.block_until_ready(out)
        _BUFFERED_SUPPORTED = True
    except Exception:
        _BUFFERED_SUPPORTED = False
    return _BUFFERED_SUPPORTED


def _weight_spec(arr):
    """Full-array, grid-invariant weight block; single VMEM buffer when supported."""
    nd = arr.ndim

    def idx(i, _nd=nd):
        return (0,) * _nd

    if _buffered_ok():
        return pl.BlockSpec(arr.shape, idx, pipeline_mode=pl.Buffered(1))
    return pl.BlockSpec(arr.shape, idx)


def _pick_batch_block(B, batch_block):
    bb = min(batch_block, B)
    while B % bb:
        bb -= 1
    return bb


def _run_encoder_layer(src, pos, kbias, p, *, nhead, compute_dtype, batch_block):
    B, S, D = src.shape
    bb = _pick_batch_block(B, batch_block)
    plist = [p[k] for k in ENC_PARAM_ORDER]
    return pl.pallas_call(
        partial(encoder_layer_kernel, nhead, compute_dtype),
        out_shape=jax.ShapeDtypeStruct((B, S, D), jnp.float32),
        grid=(B // bb,),
        in_specs=[pl.BlockSpec((bb, S, D), lambda i: (i, 0, 0)),
                  pl.BlockSpec((bb, S, D), lambda i: (i, 0, 0)),
                  pl.BlockSpec((bb, 1, S), lambda i: (i, 0, 0))]
                 + [_weight_spec(w) for w in plist],
        out_specs=pl.BlockSpec((bb, S, D), lambda i: (i, 0, 0)),
        compiler_params=pltpu.CompilerParams(
            dimension_semantics=("parallel",),
            vmem_limit_bytes=_VMEM_LIMIT_BYTES),
    )(src, pos, kbias, *plist)


def _run_decoder_layer(tgt, memory, qpos, pos, kbias, p, *, nhead, compute_dtype, batch_block):
    B, T, D = tgt.shape
    S = memory.shape[1]
    bb = _pick_batch_block(B, batch_block)
    plist = [p[k] for k in DEC_PARAM_ORDER]
    return pl.pallas_call(
        partial(decoder_layer_kernel, nhead, compute_dtype),
        out_shape=jax.ShapeDtypeStruct((B, T, D), jnp.float32),
        grid=(B // bb,),
        in_specs=[pl.BlockSpec((bb, T, D), lambda i: (i, 0, 0)),
                  pl.BlockSpec((bb, S, D), lambda i: (i, 0, 0)),
                  pl.BlockSpec((bb, T, D), lambda i: (i, 0, 0)),
                  pl.BlockSpec((bb, S, D), lambda i: (i, 0, 0)),
                  pl.BlockSpec((bb, 1, S), lambda i: (i, 0, 0))]
                 + [_weight_spec(w) for w in plist],
        out_specs=pl.BlockSpec((bb, T, D), lambda i: (i, 0, 0)),
        compiler_params=pltpu.CompilerParams(
            dimension_semantics=("parallel",),
            vmem_limit_bytes=_VMEM_LIMIT_BYTES),
    )(tgt, memory, qpos, pos, kbias, *plist)


# --------------------------- full Transformer.forward -------------------------

def transformer_forward(src, mask, query_embed, pos_embed, params, *,
                        nhead, compute_dtype=jnp.float32, batch_block=8):
    """DETR Transformer.forward (eval mode).

    src / pos_embed: (B, C, H, W); mask: (B, H, W) bool (True = padded); query_embed: (NQ, C).
    Returns (hs, memory) with hs: (1, B, NQ, C)  (== hs.transpose(1, 2) in torch),
    memory: (B, C, H, W).
    """
    bs, c, h, w = src.shape
    S = h * w
    nq = query_embed.shape[0]

    # one-time layout conversion to the kernels' (batch, seq, d_model) layout;
    # the per-layer kernels then run transpose-free.
    src_b = jnp.transpose(src.reshape(bs, c, S), (0, 2, 1)).astype(jnp.float32)
    pos_b = jnp.transpose(pos_embed.reshape(bs, c, S), (0, 2, 1)).astype(jnp.float32)
    qpos_b = jnp.broadcast_to(query_embed[None].astype(jnp.float32), (bs, nq, c))
    tgt_b = jnp.zeros((bs, nq, c), jnp.float32)
    # key_padding_mask -> additive bias on the key axis (True = masked out)
    kbias = jnp.where(mask.reshape(bs, 1, S), -1e9, 0.0).astype(jnp.float32)

    x = src_b
    for lp in params["encoder_layers"]:
        x = _run_encoder_layer(x, pos_b, kbias, lp, nhead=nhead,
                               compute_dtype=compute_dtype, batch_block=batch_block)
    memory = x

    y = tgt_b
    for lp in params["decoder_layers"]:
        y = _run_decoder_layer(y, memory, qpos_b, pos_b, kbias, lp, nhead=nhead,
                               compute_dtype=compute_dtype, batch_block=batch_block)

    dn = params["decoder_norm"]
    y = _layernorm(y, dn["w"], dn["b"])          # final TransformerDecoder norm
    hs = y[None]                                  # (1, B, NQ, D)
    mem_out = jnp.transpose(memory, (0, 2, 1)).reshape(bs, c, h, w)
    return hs, mem_out


# ------------------------- deterministic parameter init -----------------------
# Weight layout: every projection is stored pre-transposed as (in_features, out_features).
# "wqk" corresponds to PyTorch nn.MultiheadAttention in_proj_weight's [q; k] row blocks,
# transposed and concatenated along the output axis; "wv"/"wo" are in_proj v block / out_proj,
# transposed.  "w1"/"w2" are linear1/linear2 weights, transposed.

def _rnd(key, shape, scale=0.05):
    return jax.random.normal(key, shape, jnp.float32) * scale


def _init_encoder_layer(key, d, f):
    ks = jax.random.split(key, 14)
    return {
        "wqk": _rnd(ks[0], (d, 2 * d)), "bqk": _rnd(ks[1], (1, 2 * d)),
        "wv": _rnd(ks[2], (d, d)), "bv": _rnd(ks[3], (1, d)),
        "wo": _rnd(ks[4], (d, d)), "bo": _rnd(ks[5], (1, d)),
        "w1": _rnd(ks[6], (d, f)), "b1": _rnd(ks[7], (1, f)),
        "w2": _rnd(ks[8], (f, d)), "b2": _rnd(ks[9], (1, d)),
        "ln1w": 1.0 + _rnd(ks[10], (1, d)), "ln1b": _rnd(ks[11], (1, d)),
        "ln2w": 1.0 + _rnd(ks[12], (1, d)), "ln2b": _rnd(ks[13], (1, d)),
    }


def _init_decoder_layer(key, d, f):
    ks = jax.random.split(key, 24)
    return {
        "sa_wqk": _rnd(ks[0], (d, 2 * d)), "sa_bqk": _rnd(ks[1], (1, 2 * d)),
        "sa_wv": _rnd(ks[2], (d, d)), "sa_bv": _rnd(ks[3], (1, d)),
        "sa_wo": _rnd(ks[4], (d, d)), "sa_bo": _rnd(ks[5], (1, d)),
        "ca_wq": _rnd(ks[6], (d, d)), "ca_bq": _rnd(ks[7], (1, d)),
        "ca_wk": _rnd(ks[8], (d, d)), "ca_bk": _rnd(ks[9], (1, d)),
        "ca_wv": _rnd(ks[10], (d, d)), "ca_bv": _rnd(ks[11], (1, d)),
        "ca_wo": _rnd(ks[12], (d, d)), "ca_bo": _rnd(ks[13], (1, d)),
        "w1": _rnd(ks[14], (d, f)), "b1": _rnd(ks[15], (1, f)),
        "w2": _rnd(ks[16], (f, d)), "b2": _rnd(ks[17], (1, d)),
        "ln1w": 1.0 + _rnd(ks[18], (1, d)), "ln1b": _rnd(ks[19], (1, d)),
        "ln2w": 1.0 + _rnd(ks[20], (1, d)), "ln2b": _rnd(ks[21], (1, d)),
        "ln3w": 1.0 + _rnd(ks[22], (1, d)), "ln3b": _rnd(ks[23], (1, d)),
    }


def init_transformer_params(key, d_model, dim_ff, num_enc, num_dec):
    ks = jax.random.split(key, num_enc + num_dec + 1)
    return {
        "encoder_layers": [_init_encoder_layer(ks[i], d_model, dim_ff)
                           for i in range(num_enc)],
        "decoder_layers": [_init_decoder_layer(ks[num_enc + i], d_model, dim_ff)
                           for i in range(num_dec)],
        "decoder_norm": {"w": 1.0 + _rnd(ks[-1], (1, d_model)),
                         "b": jnp.zeros((1, d_model), jnp.float32)},
    }


_MATMUL_WEIGHT_KEYS = {"wqk", "wv", "wo", "w1", "w2",
                       "sa_wqk", "sa_wv", "sa_wo",
                       "ca_wq", "ca_wk", "ca_wv", "ca_wo"}


def cast_matmul_weights(params, dtype):
    """Cast the large matmul weights to `dtype` (e.g. bf16 for the MXU); biases and
    LayerNorm parameters stay f32."""
    def c(layer):
        return {k: (v.astype(dtype) if k in _MATMUL_WEIGHT_KEYS else v)
                for k, v in layer.items()}
    return {"encoder_layers": [c(lp) for lp in params["encoder_layers"]],
            "decoder_layers": [c(lp) for lp in params["decoder_layers"]],
            "decoder_norm": params["decoder_norm"]}


# --------------------------- pure-JAX reference (check) -----------------------
# Structured differently from the kernel (head-batched einsum, concat, exact softmax)
# so the check validates the kernel restructuring, not just the plumbing.

def _ref_mha(q_in, k_in, v_in, wq, bq, wk, bk, wv, bv, wo, bo, nhead, kbias, cdt):
    B, T, D = q_in.shape
    S = k_in.shape[1]
    hd = D // nhead
    scale = 1.0 / math.sqrt(hd)

    def proj(x, w_, b_):
        L = x.shape[1]
        y = jnp.dot(x.reshape(B * L, D).astype(cdt), w_.astype(cdt),
                    preferred_element_type=jnp.float32)
        return y.reshape(B, L, -1) + b_

    Q = proj(q_in, wq, bq).reshape(B, T, nhead, hd).transpose(0, 2, 1, 3)
    K = proj(k_in, wk, bk).reshape(B, S, nhead, hd).transpose(0, 2, 1, 3)
    V = proj(v_in, wv, bv).reshape(B, S, nhead, hd).transpose(0, 2, 1, 3)
    s = jnp.einsum('bhtd,bhsd->bhts', Q.astype(cdt), K.astype(cdt),
                   preferred_element_type=jnp.float32) * scale
    if kbias is not None:
        s = s + kbias[:, :, None, :]
    p = jax.nn.softmax(s, axis=-1)
    ctx = jnp.einsum('bhts,bhsd->bhtd', p.astype(cdt), V.astype(cdt),
                     preferred_element_type=jnp.float32)
    ctx = ctx.transpose(0, 2, 1, 3).reshape(B * T, D)
    return (jnp.dot(ctx.astype(cdt), wo.astype(cdt),
                    preferred_element_type=jnp.float32).reshape(B, T, D) + bo)


def _ref_encoder_layer(x, pos, kbias, p, nhead, cdt):
    B, S, D = x.shape
    wq, wk = p["wqk"][:, :D], p["wqk"][:, D:]
    bq, bk = p["bqk"][:, :D], p["bqk"][:, D:]
    qk_in = x + pos
    a = _ref_mha(qk_in, qk_in, x, wq, bq, wk, bk, p["wv"], p["bv"],
                 p["wo"], p["bo"], nhead, kbias, cdt)
    x = _layernorm(x + a, p["ln1w"], p["ln1b"])
    hdn = jnp.maximum(
        jnp.dot(x.reshape(B * S, D).astype(cdt), p["w1"].astype(cdt),
                preferred_element_type=jnp.float32) + p["b1"], 0.0)
    f = jnp.dot(hdn.astype(cdt), p["w2"].astype(cdt),
                preferred_element_type=jnp.float32) + p["b2"]
    return _layernorm(x + f.reshape(B, S, D), p["ln2w"], p["ln2b"])


def _ref_decoder_layer(tgt, memory, qpos, pos, kbias, p, nhead, cdt):
    B, T, D = tgt.shape
    wq, wk = p["sa_wqk"][:, :D], p["sa_wqk"][:, D:]
    bq, bk = p["sa_bqk"][:, :D], p["sa_bqk"][:, D:]
    qk_in = tgt + qpos
    a = _ref_mha(qk_in, qk_in, tgt, wq, bq, wk, bk, p["sa_wv"], p["sa_bv"],
                 p["sa_wo"], p["sa_bo"], nhead, None, cdt)
    x = _layernorm(tgt + a, p["ln1w"], p["ln1b"])
    a = _ref_mha(x + qpos, memory + pos, memory,
                 p["ca_wq"], p["ca_bq"], p["ca_wk"], p["ca_bk"],
                 p["ca_wv"], p["ca_bv"], p["ca_wo"], p["ca_bo"], nhead, kbias, cdt)
    x = _layernorm(x + a, p["ln2w"], p["ln2b"])
    hdn = jnp.maximum(
        jnp.dot(x.reshape(B * T, D).astype(cdt), p["w1"].astype(cdt),
                preferred_element_type=jnp.float32) + p["b1"], 0.0)
    f = jnp.dot(hdn.astype(cdt), p["w2"].astype(cdt),
                preferred_element_type=jnp.float32) + p["b2"]
    return _layernorm(x + f.reshape(B, T, D), p["ln3w"], p["ln3b"])


def reference_transformer(src, mask, query_embed, pos_embed, params, *,
                          nhead, compute_dtype=jnp.float32):
    bs, c, h, w = src.shape
    S = h * w
    nq = query_embed.shape[0]
    src_b = jnp.transpose(src.reshape(bs, c, S), (0, 2, 1)).astype(jnp.float32)
    pos_b = jnp.transpose(pos_embed.reshape(bs, c, S), (0, 2, 1)).astype(jnp.float32)
    qpos_b = jnp.broadcast_to(query_embed[None].astype(jnp.float32), (bs, nq, c))
    kbias = jnp.where(mask.reshape(bs, 1, S), -1e9, 0.0).astype(jnp.float32)

    x = src_b
    for lp in params["encoder_layers"]:
        x = _ref_encoder_layer(x, pos_b, kbias, lp, nhead, compute_dtype)
    y = jnp.zeros((bs, nq, c), jnp.float32)
    for lp in params["decoder_layers"]:
        y = _ref_decoder_layer(y, x, qpos_b, pos_b, kbias, lp, nhead, compute_dtype)
    dn = params["decoder_norm"]
    y = _layernorm(y, dn["w"], dn["b"])
    return y[None], jnp.transpose(x, (0, 2, 1)).reshape(bs, c, h, w)


# ------------------------------------ main ------------------------------------

if __name__ == "__main__":
    d_model, nhead, dim_ff = 32, 4, 64
    num_enc_layers, num_dec_layers = 2, 2
    bs, h, w = 2, 4, 4
    num_queries = 8

    key = jax.random.PRNGKey(0)
    k_src, k_pos, k_q, k_p = jax.random.split(key, 4)
    src = jax.random.normal(k_src, (bs, d_model, h, w), jnp.float32)
    pos_embed = jax.random.normal(k_pos, (bs, d_model, h, w), jnp.float32) * 0.1
    query_embed = jax.random.normal(k_q, (num_queries, d_model), jnp.float32)
    mask = jnp.zeros((bs, h, w), jnp.bool_).at[1, -1, -2:].set(True)   # pad 2 positions

    params = init_transformer_params(k_p, d_model, dim_ff, num_enc_layers, num_dec_layers)

    # --- f32 path (module semantics) ---
    hs, mem_out = transformer_forward(src, mask, query_embed, pos_embed, params,
                                      nhead=nhead)
    hs, mem_out = jax.block_until_ready((hs, mem_out))
    hs_ref, mem_ref_out = reference_transformer(src, mask, query_embed, pos_embed,
                                                params, nhead=nhead)
    assert hs.shape == (1, bs, num_queries, d_model)
    assert mem_out.shape == (bs, d_model, h, w)
    err_hs = float(jnp.max(jnp.abs(hs - hs_ref)))
    err_mem = float(jnp.max(jnp.abs(mem_out - mem_ref_out)))
    assert err_hs < 5e-2, f"decoder output mismatch (f32): {err_hs}"
    assert err_mem < 5e-2, f"encoder memory mismatch (f32): {err_mem}"

    # --- bf16 MXU path (v6e/v7x fast path): bf16 weights + matmul inputs,
    #     f32 accumulation / softmax / LayerNorm / residuals ---
    params_bf16 = cast_matmul_weights(params, jnp.bfloat16)
    hs_bf, _ = transformer_forward(src, mask, query_embed, pos_embed, params_bf16,
                                   nhead=nhead, compute_dtype=jnp.bfloat16)
    hs_bf = jax.block_until_ready(hs_bf)
    hs_ref_bf, _ = reference_transformer(src, mask, query_embed, pos_embed, params_bf16,
                                         nhead=nhead, compute_dtype=jnp.bfloat16)
    err_bf = float(jnp.max(jnp.abs(hs_bf - hs_ref_bf)))
    assert err_bf < 1e-1, f"decoder output mismatch (bf16): {err_bf}"

    print("KERNEL_OK")
</pallas_src>

<mosaic_0001>
module attributes {stable_mosaic.version = 11 : i64} {
  func.func @_k(%arg0: i32, %arg1: memref<8x128xf32, #tpu.memory_space<vmem>>, %arg2: memref<8x128xf32, #tpu.memory_space<vmem>>, %arg3: memref<8x128xf32, #tpu.memory_space<vmem>>) attributes {dimension_semantics = [#tpu.dimension_semantics<arbitrary>], iteration_bounds = array<i64: 2>, scalar_prefetch = 0 : i64, scratch_operands = 0 : i64, tpu.core_type = #tpu.core_type<tc>, window_params = [{pipeline_mode = #tpu.pipeline_mode<synchronous>, transform_indices = @transform_0, window_bounds = array<i64: 8, 128>}, {pipeline_mode = #tpu.pipeline_mode<synchronous>, transform_indices = @transform_1, window_bounds = array<i64: 8, 128>}, {pipeline_mode = #tpu.pipeline_mode<synchronous>, transform_indices = @transform_2, window_bounds = array<i64: 8, 128>}]} {
    %c0 = arith.constant 0 : index
    %c0_0 = arith.constant 0 : index
    %0 = vector.load %arg1[%c0, %c0_0] : memref<8x128xf32, #tpu.memory_space<vmem>>, vector<8x128xf32>
    %c0_1 = arith.constant 0 : index
    %c0_2 = arith.constant 0 : index
    %1 = vector.load %arg2[%c0_1, %c0_2] : memref<8x128xf32, #tpu.memory_space<vmem>>, vector<8x128xf32>
    %2 = arith.addf %0, %1 : vector<8x128xf32>
    %c0_3 = arith.constant 0 : index
    %c0_4 = arith.constant 0 : index
    %3 = vector.load %arg3[%c0_3, %c0_4] : memref<8x128xf32, #tpu.memory_space<vmem>>, vector<8x128xf32>
    tpu.vector_store %arg3[%c0_3, %c0_4], %2 {strides = array<i32>} : memref<8x128xf32, #tpu.memory_space<vmem>>, vector<8x128xf32>,
    return
  }
  func.func @transform_0(%arg0: i32) -> (i32, i32) {
    %c0_i32 = arith.constant 0 : i32
    %c0_i32_0 = arith.constant 0 : i32
    %c0_i32_1 = arith.constant 0 : i32
    return %c0_i32, %c0_i32_0 : i32, i32
  }
  func.func @transform_1(%arg0: i32) -> (i32, i32) {
    %c0_i32 = arith.constant 0 : i32
    %c0_i32_0 = arith.constant 0 : i32
    %c0_i32_1 = arith.constant 0 : i32
    return %c0_i32, %c0_i32_0 : i32, i32
  }
  func.func @transform_2(%arg0: i32) -> (i32, i32) {
    %c0_i32 = arith.constant 0 : i32
    %c0_i32_0 = arith.constant 0 : i32
    %c0_i32_1 = arith.constant 0 : i32
    return %c0_i32, %c0_i32_0 : i32, i32
  }
}

module attributes {stable_mosaic.version = 11 : i64} {
  func.func @encoder_layer_kernel(%arg0: i32, %arg1: memref<2x16x32xf32, #tpu.memory_space<vmem>>, %arg2: memref<2x16x32xf32, #tpu.memory_space<vmem>>, %arg3: memref<2x1x16xf32, #tpu.memory_space<vmem>>, %arg4: memref<32x64xf32, #tpu.memory_space<vmem>>, %arg5: memref<1x64xf32, #tpu.memory_space<vmem>>, %arg6: memref<32x32xf32, #tpu.memory_space<vmem>>, %arg7: memref<1x32xf32, #tpu.memory_space<vmem>>, %arg8: memref<32x32xf32, #tpu.memory_space<vmem>>, %arg9: memref<1x32xf32, #tpu.memory_space<vmem>>, %arg10: memref<32x64xf32, #tpu.memory_space<vmem>>, %arg11: memref<1x64xf32, #tpu.memory_space<vmem>>, %arg12: memref<64x32xf32, #tpu.memory_space<vmem>>, %arg13: memref<1x32xf32, #tpu.memory_space<vmem>>, %arg14: memref<1x32xf32, #tpu.memory_space<vmem>>, %arg15: memref<1x32xf32, #tpu.memory_space<vmem>>, %arg16: memref<1x32xf32, #tpu.memory_space<vmem>>, %arg17: memref<1x32xf32, #tpu.memory_space<vmem>>, %arg18: memref<2x16x32xf32, #tpu.memory_space<vmem>>) attributes {dimension_semantics = [#tpu.dimension_semantics<parallel>], iteration_bounds = array<i64: 1>, scalar_prefetch = 0 : i64, scratch_operands = 0 : i64, tpu.core_type = #tpu.core_type<tc>, window_params = [{transform_indices = @transform_0, window_bounds = array<i64: 2, 16, 32>}, {transform_indices = @transform_1, window_bounds = array<i64: 2, 16, 32>}, {transform_indices = @transform_2, window_bounds = array<i64: 2, 1, 16>}, {pipeline_mode = #tpu.pipeline_mode<synchronous>, transform_indices = @transform_3, window_bounds = array<i64: 32, 64>}, {pipeline_mode = #tpu.pipeline_mode<synchronous>, transform_indices = @transform_4, window_bounds = array<i64: 1, 64>}, {pipeline_mode = #tpu.pipeline_mode<synchronous>, transform_indices = @transform_5, window_bounds = array<i64: 32, 32>}, {pipeline_mode = #tpu.pipeline_mode<synchronous>, transform_indices = @transform_6, window_bounds = array<i64: 1, 32>}, {pipeline_mode = #tpu.pipeline_mode<synchronous>, transform_indices = @transform_7, window_bounds = array<i64: 32, 32>}, {pipeline_mode = #tpu.pipeline_mode<synchronous>, transform_indices = @transform_8, window_bounds = array<i64: 1, 32>}, {pipeline_mode = #tpu.pipeline_mode<synchronous>, transform_indices = @transform_9, window_bounds = array<i64: 32, 64>}, {pipeline_mode = #tpu.pipeline_mode<synchronous>, transform_indices = @transform_10, window_bounds = array<i64: 1, 64>}, {pipeline_mode = #tpu.pipeline_mode<synchronous>, transform_indices = @transform_11, window_bounds = array<i64: 64, 32>}, {pipeline_mode = #tpu.pipeline_mode<synchronous>, transform_indices = @transform_12, window_bounds = array<i64: 1, 32>}, {pipeline_mode = #tpu.pipeline_mode<synchronous>, transform_indices = @transform_13, window_bounds = array<i64: 1, 32>}, {pipeline_mode = #tpu.pipeline_mode<synchronous>, transform_indices = @transform_14, window_bounds = array<i64: 1, 32>}, {pipeline_mode = #tpu.pipeline_mode<synchronous>, transform_indices = @transform_15, window_bounds = array<i64: 1, 32>}, {pipeline_mode = #tpu.pipeline_mode<synchronous>, transform_indices = @transform_16, window_bounds = array<i64: 1, 32>}, {transform_indices = @transform_17, window_bounds = array<i64: 2, 16, 32>}]} {
    %c0 = arith.constant 0 : index
    %c0_0 = arith.constant 0 : index
    %c0_1 = arith.constant 0 : index
    %0 = vector.load %arg1[%c0, %c0_0, %c0_1] : memref<2x16x32xf32, #tpu.memory_space<vmem>>, vector<2x16x32xf32>
    %1 = vector.shape_cast %0 : vector<2x16x32xf32> to vector<32x32xf32>
    %c0_2 = arith.constant 0 : index
    %c0_3 = arith.constant 0 : index
    %c0_4 = arith.constant 0 : index
    %2 = vector.load %arg2[%c0_2, %c0_3, %c0_4] : memref<2x16x32xf32, #tpu.memory_space<vmem>>, vector<2x16x32xf32>
    %3 = vector.shape_cast %2 : vector<2x16x32xf32> to vector<32x32xf32>
    %c0_5 = arith.constant 0 : index
    %c0_6 = arith.constant 0 : index
    %c0_7 = arith.constant 0 : index
    %4 = vector.load %arg3[%c0_5, %c0_6, %c0_7] : memref<2x1x16xf32, #tpu.memory_space<vmem>>, vector<2x1x16xf32>
    %5 = arith.addf %1, %3 : vector<32x32xf32>
    %c0_8 = arith.constant 0 : index
    %c0_9 = arith.constant 0 : index
    %6 = vector.load %arg4[%c0_8, %c0_9] : memref<32x64xf32, #tpu.memory_space<vmem>>, vector<32x64xf32>
    %cst = arith.constant dense<0.000000e+00> : vector<32x64xf32>
    %7 = tpu.matmul %5, %6, %cst {dimension_numbers = #tpu.dot_dimension_numbers<[1], [0], [0], [1], [0, 0, 1, 1], [], []>} : vector<32x32xf32>, vector<32x64xf32>, vector<32x64xf32> -> vector<32x64xf32>
    %c0_10 = arith.constant 0 : index
    %c0_11 = arith.constant 0 : index
    %8 = vector.load %arg5[%c0_10, %c0_11] : memref<1x64xf32, #tpu.memory_space<vmem>>, vector<1x64xf32>
    %9 = vector.broadcast %8 : vector<1x64xf32> to vector<32x64xf32>
    %10 = arith.addf %7, %9 : vector<32x64xf32>
    %c0_12 = arith.constant 0 : index
    %c0_13 = arith.constant 0 : index
    %11 = vector.load %arg6[%c0_12, %c0_13] : memref<32x32xf32, #tpu.memory_space<vmem>>, vector<32x32xf32>
    %cst_14 = arith.constant dense<0.000000e+00> : vector<32x32xf32>
    %12 = tpu.matmul %1, %11, %cst_14 {dimension_numbers = #tpu.dot_dimension_numbers<[1], [0], [0], [1], [0, 0, 1, 1], [], []>} : vector<32x32xf32>, vector<32x32xf32>, vector<32x32xf32> -> vector<32x32xf32>
    %c0_15 = arith.constant 0 : index
    %c0_16 = arith.constant 0 : index
    %13 = vector.load %arg7[%c0_15, %c0_16] : memref<1x32xf32, #tpu.memory_space<vmem>>, vector<1x32xf32>
    %14 = vector.broadcast %13 : vector<1x32xf32> to vector<32x32xf32>
    %15 = arith.addf %12, %14 : vector<32x32xf32>
    %16 = vector.extract_strided_slice %10 {offsets = [0, 0], sizes = [32, 32], strides = [1, 1]} : vector<32x64xf32> to vector<32x32xf32>
    %17 = vector.extract_strided_slice %10 {offsets = [0, 32], sizes = [32, 32], strides = [1, 1]} : vector<32x64xf32> to vector<32x32xf32>
    %c0_17 = arith.constant 0 : index
    %c0_18 = arith.constant 0 : index
    %18 = vector.load %arg8[%c0_17, %c0_18] : memref<32x32xf32, #tpu.memory_space<vmem>>, vector<32x32xf32>
    %c0_19 = arith.constant 0 : index
    %c0_20 = arith.constant 0 : index
    %19 = vector.load %arg9[%c0_19, %c0_20] : memref<1x32xf32, #tpu.memory_space<vmem>>, vector<1x32xf32>
    %20 = vector.shape_cast %16 : vector<32x32xf32> to vector<2x16x32xf32>
    %21 = vector.shape_cast %17 : vector<32x32xf32> to vector<2x16x32xf32>
    %22 = vector.shape_cast %15 : vector<32x32xf32> to vector<2x16x32xf32>
    %cst_21 = arith.constant 0.000000e+00 : f32
    %23 = vector.broadcast %cst_21 : f32 to vector<32x32xf32>
    %24 = vector.extract_strided_slice %20 {offsets = [0, 0, 0], sizes = [2, 16, 8], strides = [1, 1, 1]} : vector<2x16x32xf32> to vector<2x16x8xf32>
    %25 = vector.extract_strided_slice %21 {offsets = [0, 0, 0], sizes = [2, 16, 8], strides = [1, 1, 1]} : vector<2x16x32xf32> to vector<2x16x8xf32>
    %26 = vector.extract_strided_slice %22 {offsets = [0, 0, 0], sizes = [2, 16, 8], strides = [1, 1, 1]} : vector<2x16x32xf32> to vector<2x16x8xf32>
    "tpu.trace_start"() <{level = 10 : i32, message = "btd,bsd->bts"}> : () -> ()
    %cst_22 = arith.constant dense<0.000000e+00> : vector<2x16x16xf32>
    %27 = tpu.matmul %24, %25, %cst_22 {dimension_numbers = #tpu.dot_dimension_numbers<[2], [2], [1], [1], [0, 0, 0, 1, 1, 1], [0], [0]>} : vector<2x16x8xf32>, vector<2x16x8xf32>, vector<2x16x16xf32> -> vector<2x16x16xf32>
    "tpu.trace_stop"() : () -> ()
    %cst_23 = arith.constant 0.353553385 : f32
    %28 = vector.broadcast %cst_23 : f32 to vector<2x16x16xf32>
    %29 = arith.mulf %27, %28 : vector<2x16x16xf32>
    %30 = vector.broadcast %4 : vector<2x1x16xf32> to vector<2x16x16xf32>
    %31 = arith.addf %29, %30 : vector<2x16x16xf32>
    %cst_24 = arith.constant dense<0xFF800000> : vector<2x16xf32>
    %32 = vector.multi_reduction <maximumf>, %31, %cst_24 [2] : vector<2x16x16xf32> to vector<2x16xf32>
    %33 = vector.shape_cast %32 : vector<2x16xf32> to vector<2x16x1xf32>
    %34 = vector.broadcast %33 : vector<2x16x1xf32> to vector<2x16x16xf32>
    %35 = arith.subf %31, %34 : vector<2x16x16xf32>
    %36 = math.exp %35 : vector<2x16x16xf32>
    %cst_25 = arith.constant dense<0.000000e+00> : vector<2x16xf32>
    %37 = vector.multi_reduction <add>, %36, %cst_25 [2] : vector<2x16x16xf32> to vector<2x16xf32>
    %38 = vector.shape_cast %37 : vector<2x16xf32> to vector<2x16x1xf32>
    %39 = tpu.reciprocal %38 {approx = true} : vector<2x16x1xf32> -> vector<2x16x1xf32>
    %40 = vector.broadcast %39 : vector<2x16x1xf32> to vector<2x16x16xf32>
    %41 = arith.mulf %36, %40 : vector<2x16x16xf32>
    "tpu.trace_start"() <{level = 10 : i32, message = "bts,bsd->btd"}> : () -> ()
    %cst_26 = arith.constant dense<0.000000e+00> : vector<2x16x8xf32>
    %42 = tpu.matmul %41, %26, %cst_26 {dimension_numbers = #tpu.dot_dimension_numbers<[2], [1], [1], [2], [0, 0, 0, 1, 1, 2], [0], [0]>} : vector<2x16x16xf32>, vector<2x16x8xf32>, vector<2x16x8xf32> -> vector<2x16x8xf32>
    "tpu.trace_stop"() : () -> ()
    %43 = vector.shape_cast %42 : vector<2x16x8xf32> to vector<32x8xf32>
    %44 = vector.extract_strided_slice %18 {offsets = [0, 0], sizes = [8, 32], strides = [1, 1]} : vector<32x32xf32> to vector<8x32xf32>
    %cst_27 = arith.constant dense<0.000000e+00> : vector<32x32xf32>
    %45 = tpu.matmul %43, %44, %cst_27 {dimension_numbers = #tpu.dot_dimension_numbers<[1], [0], [0], [1], [0, 0, 1, 1], [], []>} : vector<32x8xf32>, vector<8x32xf32>, vector<32x32xf32> -> vector<32x32xf32>
    %46 = arith.addf %23, %45 : vector<32x32xf32>
    %47 = vector.extract_strided_slice %20 {offsets = [0, 0, 8], sizes = [2, 16, 8], strides = [1, 1, 1]} : vector<2x16x32xf32> to vector<2x16x8xf32>
    %48 = vector.extract_strided_slice %21 {offsets = [0, 0, 8], sizes = [2, 16, 8], strides = [1, 1, 1]} : vector<2x16x32xf32> to vector<2x16x8xf32>
    %49 = vector.extract_strided_slice %22 {offsets = [0, 0, 8], sizes = [2, 16, 8], strides = [1, 1, 1]} : vector<2x16x32xf32> to vector<2x16x8xf32>
    "tpu.trace_start"() <{level = 10 : i32, message = "btd,bsd->bts"}> : () -> ()
    %cst_28 = arith.constant dense<0.000000e+00> : vector<2x16x16xf32>
    %50 = tpu.matmul %47, %48, %cst_28 {dimension_numbers = #tpu.dot_dimension_numbers<[2], [2], [1], [1], [0, 0, 0, 1, 1, 1], [0], [0]>} : vector<2x16x8xf32>, vector<2x16x8xf32>, vector<2x16x16xf32> -> vector<2x16x16xf32>
    "tpu.trace_stop"() : () -> ()
    %cst_29 = arith.constant 0.353553385 : f32
    %51 = vector.broadcast %cst_29 : f32 to vector<2x16x16xf32>
    %52 = arith.mulf %50, %51 : vector<2x16x16xf32>
    %53 = vector.broadcast %4 : vector<2x1x16xf32> to vector<2x16x16xf32>
    %54 = arith.addf %52, %53 : vector<2x16x16xf32>
    %cst_30 = arith.constant dense<0xFF800000> : vector<2x16xf32>
    %55 = vector.multi_reduction <maximumf>, %54, %cst_30 [2] : vector<2x16x16xf32> to vector<2x16xf32>
    %56 = vector.shape_cast %55 : vector<2x16xf32> to vector<2x16x1xf32>
    %57 = vector.broadcast %56 : vector<2x16x1xf32> to vector<2x16x16xf32>
    %58 = arith.subf %54, %57 : vector<2x16x16xf32>
    %59 = math.exp %58 : vector<2x16x16xf32>
    %cst_31 = arith.constant dense<0.000000e+00> : vector<2x16xf32>
    %60 = vector.multi_reduction <add>, %59, %cst_31 [2] : vector<2x16x16xf32> to vector<2x16xf32>
    %61 = vector.shape_cast %60 : vector<2x16xf32> to vector<2x16x1xf32>
    %62 = tpu.reciprocal %61 {approx = true} : vector<2x16x1xf32> -> vector<2x16x1xf32>
    %63 = vector.broadcast %62 : vector<2x16x1xf32> to vector<2x16x16xf32>
    %64 = arith.mulf %59, %63 : vector<2x16x16xf32>
    "tpu.trace_start"() <{level = 10 : i32, message = "bts,bsd->btd"}> : () -> ()
    %cst_32 = arith.constant dense<0.000000e+00> : vector<2x16x8xf32>
    %65 = tpu.matmul %64, %49, %cst_32 {dimension_numbers = #tpu.dot_dimension_numbers<[2], [1], [1], [2], [0, 0, 0, 1, 1, 2], [0], [0]>} : vector<2x16x16xf32>, vector<2x16x8xf32>, vector<2x16x8xf32> -> vector<2x16x8xf32>
    "tpu.trace_stop"() : () -> ()
    %66 = vector.shape_cast %65 : vector<2x16x8xf32> to vector<32x8xf32>
    %67 = vector.extract_strided_slice %18 {offsets = [8, 0], sizes = [8, 32], strides = [1, 1]} : vector<32x32xf32> to vector<8x32xf32>
    %cst_33 = arith.constant dense<0.000000e+00> : vector<32x32xf32>
    %68 = tpu.matmul %66, %67, %cst_33 {dimension_numbers = #tpu.dot_dimension_numbers<[1], [0], [0], [1], [0, 0, 1, 1], [], []>} : vector<32x8xf32>, vector<8x32xf32>, vector<32x32xf32> -> vector<32x32xf32>
    %69 = arith.addf %46, %68 : vector<32x32xf32>
    %70 = vector.extract_strided_slice %20 {offsets = [0, 0, 16], sizes = [2, 16, 8], strides = [1, 1, 1]} : vector<2x16x32xf32> to vector<2x16x8xf32>
    %71 = vector.extract_strided_slice %21 {offsets = [0, 0, 16], sizes = [2, 16, 8], strides = [1, 1, 1]} : vector<2x16x32xf32> to vector<2x16x8xf32>
    %72 = vector.extract_strided_slice %22 {offsets = [0, 0, 16], sizes = [2, 16, 8], strides = [1, 1, 1]} : vector<2x16x32xf32> to vector<2x16x8xf32>
    "tpu.trace_start"() <{level = 10 : i32, message = "btd,bsd->bts"}> : () -> ()
    %cst_34 = arith.constant dense<0.000000e+00> : vector<2x16x16xf32>
    %73 = tpu.matmul %70, %71, %cst_34 {dimension_numbers = #tpu.dot_dimension_numbers<[2], [2], [1], [1], [0, 0, 0, 1, 1, 1], [0], [0]>} : vector<2x16x8xf32>, vector<2x16x8xf32>, vector<2x16x16xf32> -> vector<2x16x16xf32>
    "tpu.trace_stop"() : () -> ()
    %cst_35 = arith.constant 0.353553385 : f32
    %74 = vector.broadcast %cst_35 : f32 to vector<2x16x16xf32>
    %75 = arith.mulf %73, %74 : vector<2x16x16xf32>
    %76 = vector.broadcast %4 : vector<2x1x16xf32> to vector<2x16x16xf32>
    %77 = arith.addf %75, %76 : vector<2x16x16xf32>
    %cst_36 = arith.constant dense<0xFF800000> : vector<2x16xf32>
    %78 = vector.multi_reduction <maximumf>, %77, %cst_36 [2] : vector<2x16x16xf32> to vector<2x16xf32>
    %79 = vector.shape_cast %78 : vector<2x16xf32> to vector<2x16x1xf32>
    %80 = vector.broadcast %79 : vector<2x16x1xf32> to vector<2x16x16xf32>
    %81 = arith.subf %77, %80 : vector<2x16x16xf32>
    %82 = math.exp %81 : vector<2x16x16xf32>
    %cst_37 = arith.constant dense<0.000000e+00> : vector<2x16xf32>
    %83 = vector.multi_reduction <add>, %82, %cst_37 [2] : vector<2x16x16xf32> to vector<2x16xf32>
    %84 = vector.shape_cast %83 : vector<2x16xf32> to vector<2x16x1xf32>
    %85 = tpu.reciprocal %84 {approx = true} : vector<2x16x1xf32> -> vector<2x16x1xf32>
    %86 = vector.broadcast %85 : vector<2x16x1xf32> to vector<2x16x16xf32>
    %87 = arith.mulf %82, %86 : vector<2x16x16xf32>
    "tpu.trace_start"() <{level = 10 : i32, message = "bts,bsd->btd"}> : () -> ()
    %cst_38 = arith.constant dense<0.000000e+00> : vector<2x16x8xf32>
    %88 = tpu.matmul %87, %72, %cst_38 {dimension_numbers = #tpu.dot_dimension_numbers<[2], [1], [1], [2], [0, 0, 0, 1, 1, 2], [0], [0]>} : vector<2x16x16xf32>, vector<2x16x8xf32>, vector<2x16x8xf32> -> vector<2x16x8xf32>
    "tpu.trace_stop"() : () -> ()
    %89 = vector.shape_cast %88 : vector<2x16x8xf32> to vector<32x8xf32>
    %90 = vector.extract_strided_slice %18 {offsets = [16, 0], sizes = [8, 32], strides = [1, 1]} : vector<32x32xf32> to vector<8x32xf32>
    %cst_39 = arith.constant dense<0.000000e+00> : vector<32x32xf32>
    %91 = tpu.matmul %89, %90, %cst_39 {dimension_numbers = #tpu.dot_dimension_numbers<[1], [0], [0], [1], [0, 0, 1, 1], [], []>} : vector<32x8xf32>, vector<8x32xf32>, vector<32x32xf32> -> vector<32x32xf32>
    %92 = arith.addf %69, %91 : vector<32x32xf32>
    %93 = vector.extract_strided_slice %20 {offsets = [0, 0, 24], sizes = [2, 16, 8], strides = [1, 1, 1]} : vector<2x16x32xf32> to vector<2x16x8xf32>
    %94 = vector.extract_strided_slice %21 {offsets = [0, 0, 24], sizes = [2, 16, 8], strides = [1, 1, 1]} : vector<2x16x32xf32> to vector<2x16x8xf32>
    %95 = vector.extract_strided_slice %22 {offsets = [0, 0, 24], sizes = [2, 16, 8], strides = [1, 1, 1]} : vector<2x16x32xf32> to vector<2x16x8xf32>
    "tpu.trace_start"() <{level = 10 : i32, message = "btd,bsd->bts"}> : () -> ()
    %cst_40 = arith.constant dense<0.000000e+00> : vector<2x16x16xf32>
    %96 = tpu.matmul %93, %94, %cst_40 {dimension_numbers = #tpu.dot_dimension_numbers<[2], [2], [1], [1], [0, 0, 0, 1, 1, 1], [0], [0]>} : vector<2x16x8xf32>, vector<2x16x8xf32>, vector<2x16x16xf32> -> vector<2x16x16xf32>
    "tpu.trace_stop"() : () -> ()
    %cst_41 = arith.constant 0.353553385 : f32
    %97 = vector.broadcast %cst_41 : f32 to vector<2x16x16xf32>
    %98 = arith.mulf %96, %97 : vector<2x16x16xf32>
    %99 = vector.broadcast %4 : vector<2x1x16xf32> to vector<2x16x16xf32>
    %100 = arith.addf %98, %99 : vector<2x16x16xf32>
    %cst_42 = arith.constant dense<0xFF800000> : vector<2x16xf32>
    %101 = vector.multi_reduction <maximumf>, %100, %cst_42 [2] : vector<2x16x16xf32> to vector<2x16xf32>
    %102 = vector.shape_cast %101 : vector<2x16xf32> to vector<2x16x1xf32>
    %103 = vector.broadcast %102 : vector<2x16x1xf32> to vector<2x16x16xf32>
    %104 = arith.subf %100, %103 : vector<2x16x16xf32>
    %105 = math.exp %104 : vector<2x16x16xf32>
    %cst_43 = arith.constant dense<0.000000e+00> : vector<2x16xf32>
    %106 = vector.multi_reduction <add>, %105, %cst_43 [2] : vector<2x16x16xf32> to vector<2x16xf32>
    %107 = vector.shape_cast %106 : vector<2x16xf32> to vector<2x16x1xf32>
    %108 = tpu.reciprocal %107 {approx = true} : vector<2x16x1xf32> -> vector<2x16x1xf32>
    %109 = vector.broadcast %108 : vector<2x16x1xf32> to vector<2x16x16xf32>
    %110 = arith.mulf %105, %109 : vector<2x16x16xf32>
    "tpu.trace_start"() <{level = 10 : i32, message = "bts,bsd->btd"}> : () -> ()
    %cst_44 = arith.constant dense<0.000000e+00> : vector<2x16x8xf32>
    %111 = tpu.matmul %110, %95, %cst_44 {dimension_numbers = #tpu.dot_dimension_numbers<[2], [1], [1], [2], [0, 0, 0, 1, 1, 2], [0], [0]>} : vector<2x16x16xf32>, vector<2x16x8xf32>, vector<2x16x8xf32> -> vector<2x16x8xf32>
    "tpu.trace_stop"() : () -> ()
    %112 = vector.shape_cast %111 : vector<2x16x8xf32> to vector<32x8xf32>
    %113 = vector.extract_strided_slice %18 {offsets = [24, 0], sizes = [8, 32], strides = [1, 1]} : vector<32x32xf32> to vector<8x32xf32>
    %cst_45 = arith.constant dense<0.000000e+00> : vector<32x32xf32>
    %114 = tpu.matmul %112, %113, %cst_45 {dimension_numbers = #tpu.dot_dimension_numbers<[1], [0], [0], [1], [0, 0, 1, 1], [], []>} : vector<32x8xf32>, vector<8x32xf32>, vector<32x32xf32> -> vector<32x32xf32>
    %115 = arith.addf %92, %114 : vector<32x32xf32>
    %116 = vector.broadcast %19 : vector<1x32xf32> to vector<32x32xf32>
    %117 = arith.addf %115, %116 : vector<32x32xf32>
    %118 = arith.addf %1, %117 : vector<32x32xf32>
    %c0_46 = arith.constant 0 : index
    %c0_47 = arith.constant 0 : index
    %119 = vector.load %arg14[%c0_46, %c0_47] : memref<1x32xf32, #tpu.memory_space<vmem>>, vector<1x32xf32>
    %c0_48 = arith.constant 0 : index
    %c0_49 = arith.constant 0 : index
    %120 = vector.load %arg15[%c0_48, %c0_49] : memref<1x32xf32, #tpu.memory_space<vmem>>, vector<1x32xf32>
    %cst_50 = arith.constant dense<0.000000e+00> : vector<32xf32>
    %121 = vector.multi_reduction <add>, %118, %cst_50 [1] : vector<32x32xf32> to vector<32xf32>
    %122 = vector.shape_cast %121 : vector<32xf32> to vector<32x1xf32>
    %cst_51 = arith.constant 3.200000e+01 : f32
    %123 = vector.broadcast %cst_51 : f32 to vector<32x1xf32>
    %124 = arith.divf %122, %123 : vector<32x1xf32>
    %125 = vector.broadcast %124 : vector<32x1xf32> to vector<32x32xf32>
    %126 = arith.subf %118, %125 : vector<32x32xf32>
    %127 = arith.mulf %126, %126 : vector<32x32xf32>
    %cst_52 = arith.constant dense<0.000000e+00> : vector<32xf32>
    %128 = vector.multi_reduction <add>, %127, %cst_52 [1] : vector<32x32xf32> to vector<32xf32>
    %129 = vector.shape_cast %128 : vector<32xf32> to vector<32x1xf32>
    %cst_53 = arith.constant 3.200000e+01 : f32
    %130 = vector.broadcast %cst_53 : f32 to vector<32x1xf32>
    %131 = arith.divf %129, %130 : vector<32x1xf32>
    %132 = vector.broadcast %124 : vector<32x1xf32> to vector<32x32xf32>
    %133 = arith.subf %118, %132 : vector<32x32xf32>
    %cst_54 = arith.constant 9.99999974E-6 : f32
    %134 = vector.broadcast %cst_54 : f32 to vector<32x1xf32>
    %135 = arith.addf %131, %134 : vector<32x1xf32>
    %136 = math.rsqrt %135 : vector<32x1xf32>
    %137 = vector.broadcast %136 : vector<32x1xf32> to vector<32x32xf32>
    %138 = arith.mulf %133, %137 : vector<32x32xf32>
    %139 = vector.broadcast %119 : vector<1x32xf32> to vector<32x32xf32>
    %140 = arith.mulf %138, %139 : vector<32x32xf32>
    %141 = vector.broadcast %120 : vector<1x32xf32> to vector<32x32xf32>
    %142 = arith.addf %140, %141 : vector<32x32xf32>
    %c0_55 = arith.constant 0 : index
    %c0_56 = arith.constant 0 : index
    %143 = vector.load %arg10[%c0_55, %c0_56] : memref<32x64xf32, #tpu.memory_space<vmem>>, vector<32x64xf32>
    %cst_57 = arith.constant dense<0.000000e+00> : vector<32x64xf32>
    %144 = tpu.matmul %142, %143, %cst_57 {dimension_numbers = #tpu.dot_dimension_numbers<[1], [0], [0], [1], [0, 0, 1, 1], [], []>} : vector<32x32xf32>, vector<32x64xf32>, vector<32x64xf32> -> vector<32x64xf32>
    %c0_58 = arith.constant 0 : index
    %c0_59 = arith.constant 0 : index
    %145 = vector.load %arg11[%c0_58, %c0_59] : memref<1x64xf32, #tpu.memory_space<vmem>>, vector<1x64xf32>
    %146 = vector.broadcast %145 : vector<1x64xf32> to vector<32x64xf32>
    %147 = arith.addf %144, %146 : vector<32x64xf32>
    %cst_60 = arith.constant 0.000000e+00 : f32
    %148 = vector.broadcast %cst_60 : f32 to vector<32x64xf32>
    %149 = arith.maximumf %147, %148 : vector<32x64xf32>
    %c0_61 = arith.constant 0 : index
    %c0_62 = arith.constant 0 : index
    %150 = vector.load %arg12[%c0_61, %c0_62] : memref<64x32xf32, #tpu.memory_space<vmem>>, vector<64x32xf32>
    %cst_63 = arith.constant dense<0.000000e+00> : vector<32x32xf32>
    %151 = tpu.matmul %149, %150, %cst_63 {dimension_numbers = #tpu.dot_dimension_numbers<[1], [0], [0], [1], [0, 0, 1, 1], [], []>} : vector<32x64xf32>, vector<64x32xf32>, vector<32x32xf32> -> vector<32x32xf32>
    %c0_64 = arith.constant 0 : index
    %c0_65 = arith.constant 0 : index
    %152 = vector.load %arg13[%c0_64, %c0_65] : memref<1x32xf32, #tpu.memory_space<vmem>>, vector<1x32xf32>
    %153 = vector.broadcast %152 : vector<1x32xf32> to vector<32x32xf32>
    %154 = arith.addf %151, %153 : vector<32x32xf32>
    %155 = arith.addf %142, %154 : vector<32x32xf32>
    %c0_66 = arith.constant 0 : index
    %c0_67 = arith.constant 0 : index
    %156 = vector.load %arg16[%c0_66, %c0_67] : memref<1x32xf32, #tpu.memory_space<vmem>>, vector<1x32xf32>
    %c0_68 = arith.constant 0 : index
    %c0_69 = arith.constant 0 : index
    %157 = vector.load %arg17[%c0_68, %c0_69] : memref<1x32xf32, #tpu.memory_space<vmem>>, vector<1x32xf32>
    %cst_70 = arith.constant dense<0.000000e+00> : vector<32xf32>
    %158 = vector.multi_reduction <add>, %155, %cst_70 [1] : vector<32x32xf32> to vector<32xf32>
    %159 = vector.shape_cast %158 : vector<32xf32> to vector<32x1xf32>
    %cst_71 = arith.constant 3.200000e+01 : f32
    %160 = vector.broadcast %cst_71 : f32 to vector<32x1xf32>
    %161 = arith.divf %159, %160 : vector<32x1xf32>
    %162 = vector.broadcast %161 : vector<32x1xf32> to vector<32x32xf32>
    %163 = arith.subf %155, %162 : vector<32x32xf32>
    %164 = arith.mulf %163, %163 : vector<32x32xf32>
    %cst_72 = arith.constant dense<0.000000e+00> : vector<32xf32>
    %165 = vector.multi_reduction <add>, %164, %cst_72 [1] : vector<32x32xf32> to vector<32xf32>
    %166 = vector.shape_cast %165 : vector<32xf32> to vector<32x1xf32>
    %cst_73 = arith.constant 3.200000e+01 : f32
    %167 = vector.broadcast %cst_73 : f32 to vector<32x1xf32>
    %168 = arith.divf %166, %167 : vector<32x1xf32>
    %169 = vector.broadcast %161 : vector<32x1xf32> to vector<32x32xf32>
    %170 = arith.subf %155, %169 : vector<32x32xf32>
    %cst_74 = arith.constant 9.99999974E-6 : f32
    %171 = vector.broadcast %cst_74 : f32 to vector<32x1xf32>
    %172 = arith.addf %168, %171 : vector<32x1xf32>
    %173 = math.rsqrt %172 : vector<32x1xf32>
    %174 = vector.broadcast %173 : vector<32x1xf32> to vector<32x32xf32>
    %175 = arith.mulf %170, %174 : vector<32x32xf32>
    %176 = vector.broadcast %156 : vector<1x32xf32> to vector<32x32xf32>
    %177 = arith.mulf %175, %176 : vector<32x32xf32>
    %178 = vector.broadcast %157 : vector<1x32xf32> to vector<32x32xf32>
    %179 = arith.addf %177, %178 : vector<32x32xf32>
    %180 = vector.shape_cast %179 : vector<32x32xf32> to vector<2x16x32xf32>
    %c0_75 = arith.constant 0 : index
    %c0_76 = arith.constant 0 : index
    %c0_77 = arith.constant 0 : index
    %181 = vector.load %arg18[%c0_75, %c0_76, %c0_77] : memref<2x16x32xf32, #tpu.memory_space<vmem>>, vector<2x16x32xf32>
    tpu.vector_store %arg18[%c0_75, %c0_76, %c0_77], %180 {strides = array<i32>} : memref<2x16x32xf32, #tpu.memory_space<vmem>>, vector<2x16x32xf32>,
    return
  }
  func.func @transform_0(%arg0: i32) -> (i32, i32, i32) {
    %c0_i32 = arith.constant 0 : i32
    %c0_i32_0 = arith.constant 0 : i32
    %c0_i32_1 = arith.constant 0 : i32
    return %arg0, %c0_i32, %c0_i32_0 : i32, i32, i32
  }
  func.func @transform_1(%arg0: i32) -> (i32, i32, i32) {
    %c0_i32 = arith.constant 0 : i32
    %c0_i32_0 = arith.constant 0 : i32
    %c0_i32_1 = arith.constant 0 : i32
    return %arg0, %c0_i32, %c0_i32_0 : i32, i32, i32
  }
  func.func @transform_2(%arg0: i32) -> (i32, i32, i32) {
    %c0_i32 = arith.constant 0 : i32
    %c0_i32_0 = arith.constant 0 : i32
    %c0_i32_1 = arith.constant 0 : i32
    return %arg0, %c0_i32, %c0_i32_0 : i32, i32, i32
  }
  func.func @transform_3(%arg0: i32) -> (i32, i32) {
    %c0_i32 = arith.constant 0 : i32
    %c0_i32_0 = arith.constant 0 : i32
    %c0_i32_1 = arith.constant 0 : i32
    return %c0_i32, %c0_i32_0 : i32, i32
  }
  func.func @transform_4(%arg0: i32) -> (i32, i32) {
    %c0_i32 = arith.constant 0 : i32
    %c0_i32_0 = arith.constant 0 : i32
    %c0_i32_1 = arith.constant 0 : i32
    return %c0_i32, %c0_i32_0 : i32, i32
  }
  func.func @transform_5(%arg0: i32) -> (i32, i32) {
    %c0_i32 = arith.constant 0 : i32
    %c0_i32_0 = arith.constant 0 : i32
    %c0_i32_1 = arith.constant 0 : i32
    return %c0_i32, %c0_i32_0 : i32, i32
  }
  func.func @transform_6(%arg0: i32) -> (i32, i32) {
    %c0_i32 = arith.constant 0 : i32
    %c0_i32_0 = arith.constant 0 : i32
    %c0_i32_1 = arith.constant 0 : i32
    return %c0_i32, %c0_i32_0 : i32, i32
  }
  func.func @transform_7(%arg0: i32) -> (i32, i32) {
    %c0_i32 = arith.constant 0 : i32
    %c0_i32_0 = arith.constant 0 : i32
    %c0_i32_1 = arith.constant 0 : i32
    return %c0_i32, %c0_i32_0 : i32, i32
  }
  func.func @transform_8(%arg0: i32) -> (i32, i32) {
    %c0_i32 = arith.constant 0 : i32
    %c0_i32_0 = arith.constant 0 : i32
    %c0_i32_1 = arith.constant 0 : i32
    return %c0_i32, %c0_i32_0 : i32, i32
  }
  func.func @transform_9(%arg0: i32) -> (i32, i32) {
    %c0_i32 = arith.constant 0 : i32
    %c0_i32_0 = arith.constant 0 : i32
    %c0_i32_1 = arith.constant 0 : i32
    return %c0_i32, %c0_i32_0 : i32, i32
  }
  func.func @transform_10(%arg0: i32) -> (i32, i32) {
    %c0_i32 = arith.constant 0 : i32
    %c0_i32_0 = arith.constant 0 : i32
    %c0_i32_1 = arith.constant 0 : i32
    return %c0_i32, %c0_i32_0 : i32, i32
  }
  func.func @transform_11(%arg0: i32) -> (i32, i32) {
    %c0_i32 = arith.constant 0 : i32
    %c0_i32_0 = arith.constant 0 : i32
    %c0_i32_1 = arith.constant 0 : i32
    return %c0_i32, %c0_i32_0 : i32, i32
  }
  func.func @transform_12(%arg0: i32) -> (i32, i32) {
    %c0_i32 = arith.constant 0 : i32
    %c0_i32_0 = arith.constant 0 : i32
    %c0_i32_1 = arith.constant 0 : i32
    return %c0_i32, %c0_i32_0 : i32, i32
  }
  func.func @transform_13(%arg0: i32) -> (i32, i32) {
    %c0_i32 = arith.constant 0 : i32
    %c0_i32_0 = arith.constant 0 : i32
    %c0_i32_1 = arith.constant 0 : i32
    return %c0_i32, %c0_i32_0 : i32, i32
  }
  func.func @transform_14(%arg0: i32) -> (i32, i32) {
    %c0_i32 = arith.constant 0 : i32
    %c0_i32_0 = arith.constant 0 : i32
    %c0_i32_1 = arith.constant 0 : i32
    return %c0_i32, %c0_i32_0 : i32, i32
  }
  func.func @transform_15(%arg0: i32) -> (i32, i32) {
    %c0_i32 = arith.constant 0 : i32
    %c0_i32_0 = arith.constant 0 : i32
    %c0_i32_1 = arith.constant 0 : i32
    return %c0_i32, %c0_i32_0 : i32, i32
  }
  func.func @transform_16(%arg0: i32) -> (i32, i32) {
    %c0_i32 = arith.constant 0 : i32
    %c0_i32_0 = arith.constant 0 : i32
    %c0_i32_1 = arith.constant 0 : i32
    return %c0_i32, %c0_i32_0 : i32, i32
  }
  func.func @transform_17(%arg0: i32) -> (i32, i32, i32) {
    %c0_i32 = arith.constant 0 : i32
    %c0_i32_0 = arith.constant 0 : i32
    %c0_i32_1 = arith.constant 0 : i32
    return %arg0, %c0_i32, %c0_i32_0 : i32, i32, i32
  }
}

</mosaic_0001>

<bundles_post_ra>
// kernel: tpu_custom_call.1
= control target key start
LH: loop header
LB: loop body
LE: loop exit
PB: predicated region body
PF: predicated region fallthrough
CT: control target
= control target key end

     0   :  { %7 = vsyncpa [#allocation3], 0  ;;  %s417_s0 = inlined_call_operand.hbm [shape: f32[8,128], index: 0, kind: input, shape index: {}]   ;;  %s418_s1 = inlined_call_operand.hbm [shape: f32[8,128], index: 1, kind: input, shape index: {}]   ;;  %s419_s2 = inlined_call_operand.hbm [shape: f32[8,128], index: 2, kind: output, shape index: {}]  }
   0x1   :  { %8 = vsyncpa [#allocation6], 0 }
   0x2   :  { %9 = vsyncpa [#allocation4], 0  ;;  %s375_s9 = smov 0  }
   0x3 LB: > { %s95_s12 = sshll.u32 %s417_s0, 4  ;;  %s202_s13 = sadd.s32 4294967295, %s355_s9   ;;  %s355_s9 = sphi %s375_s9, %s15_s9   ;;  %s96_s12 = int_to_ptr.hbm [resolvable:$true] %s95_s12 }
   0x4   : > { %p203_p0 = scmp.ge.s32.totalorder %s355_s9, 1  ;;  %p83_p1 = scmp.lt.s32.totalorder %s355_s9, 3 }
   0x5   : > { %p386_p2 = scmp.eq.s32.totalorder %s202_s13, 0  ;;  %s357_s16 = smov [#allocation2]  }
   0x6   : > { %p390_p3 = pnand %p203_p0, %p83_p1  ;;  %s97_s17 = sshll.u32 %s357_s16, 4  ;;  %s98_s17 = int_to_ptr.vmem [resolvable:$true] %s97_s17 }
   0x7   : > { %s107_s20 = sshll.u32 %s418_s1, 4  ;;  %s358_s21 = smov [#allocation5]   ;;  %s108_s20 = int_to_ptr.hbm [resolvable:$true] %s107_s20 }
   0x8   : > { %p225_p4 = pneg %p390_p3  ;;  %s109_s22 = sshll.u32 %s358_s21, 4  ;;  %s110_s22 = int_to_ptr.vmem [resolvable:$true] %s109_s22 }
   0x9   : > { %122 = sbr.rel (%p390_p3) target bundleno = 24 (0x18), region = 28 }
   0xa   : > { %p226_p5 = pnand %p386_p2, %p225_p4 }
   0xc   : > { %228 = dma.hbm_to_vmem [thread:$0]  (!%p226_p5), %s96_s12, 128, %s98_s17, [#allocation3]  }
   0xd   : > { %231 = dma.hbm_to_vmem [thread:$0]  (!%p226_p5), %s108_s20, 128, %s110_s22, [#allocation6]  }
   0xe   : > { %342 = dma.done.wait (%p386_p2), [#allocation3], 128  }
   0xf   : > { %344 = vsyncadd (%p386_p2), [#allocation3], 4294967168 }
  0x10   : > { %346 = dma.done.wait (%p386_p2), [#allocation6], 128  }
  0x11   : > { %348 = vsyncadd (%p386_p2), [#allocation6], 4294967168  ;;  %s359_s23 = smov [#allocation7]   ;;  %s152_s27 = sshll.u32 %s419_s2, 4  ;;  %v140_v0 = vld [vmem:[#allocation2] sm:$0xff]  ;;  %v141_v1 = vld [vmem:[#allocation5] sm:$0xff]  ;;  %s153_s27 = int_to_ptr.hbm [resolvable:$true] %s152_s27 }
  0x12   : > { %s150_s24 = sshll.u32 %s359_s23, 4  ;;  %p236_p6 = scmp.eq.s32.totalorder %s202_s13, 1  ;;  %v142_v2 = vadd.f32 %v141_v1, %v140_v0  ;;  %s151_s24 = int_to_ptr.vmem [resolvable:$true] %s150_s24 }
  0x14   : > { %143 = vst [vmem:[#allocation7] sm:$0xff] %v142_v2 }
  0x15   : > { %222 = dma.vmem_to_hbm [thread:$0]  (%p236_p6), %s151_s24, 128, %s153_s27, [#allocation4]  }
  0x16   : > { %350 = dma.done.wait (%p236_p6), [#allocation4], 128  }
  0x17   : > { %352 = vsyncadd (%p236_p6), [#allocation4], 4294967168 }
  0x18 PF: > { %s15_s9 = sadd.s32 1, %s355_s9  }
  0x19   : > { %p12_p7 = scmp.ge.s32.totalorder %s15_s9, 4  }
  0x1b   :  { %14 = sbr.rel (!%p12_p7) target bundleno = 3 (0x3), region = 61 }
  0x20   :  { %166 = vsyncpa [#allocation3], 1 }
  0x21   :  { %168 = vsyncpa [#allocation3 + $0x1], 1 }
  0x22   :  { %169 = vsyncpa [#allocation6], 1 }
  0x23   :  { %170 = vsyncpa [#allocation4], 1 }
  0x24   :  { %172 = vsyncpa [#allocation4 + $0x1], 1 }

// kernel: tpu_custom_call.1
= control target key start
LH: loop header
LB: loop body
LE: loop exit
PB: predicated region body
PF: predicated region fallthrough
CT: control target
= control target key end

     0   :  { %s2479_s0 = inlined_call_operand.vmem [shape: f32[2,16,32], index: 0, kind: input, shape index: {}]   ;;  %s2480_s1 = inlined_call_operand.vmem [shape: f32[2,16,32], index: 1, kind: input, shape index: {}]   ;;  %s2481_s2 = inlined_call_operand.hbm [shape: f32[2,1,16], index: 2, kind: input, shape index: {}]   ;;  %s2482_s3 = inlined_call_operand.vmem [shape: f32[32,64], index: 3, kind: input, shape index: {}]   ;;  %s2483_s4 = inlined_call_operand.vmem [shape: f32[1,64], index: 4, kind: input, shape index: {}]   ;;  %s2484_s5 = inlined_call_operand.hbm [shape: f32[32,32], index: 5, kind: input, shape index: {}]   ;;  %s2485_s6 = inlined_call_operand.vmem [shape: f32[1,32], index: 6, kind: input, shape index: {}]   ;;  %s2486_s7 = inlined_call_operand.hbm [shape: f32[32,32], index: 7, kind: input, shape index: {}]   ;;  %s2487_s8 = inlined_call_operand.vmem [shape: f32[1,32], index: 8, kind: input, shape index: {}]   ;;  %s2488_s9 = inlined_call_operand.hbm [shape: f32[32,64], index: 9, kind: input, shape index: {}]   ;;  %s2489_s10 = inlined_call_operand.vmem [shape: f32[1,64], index: 10, kind: input, shape index: {}]   ;;  %s2490_s11 = inlined_call_operand.vmem [shape: f32[64,32], index: 11, kind: input, shape index: {}]   ;;  %s2491_s12 = inlined_call_operand.vmem [shape: f32[1,32], index: 12, kind: input, shape index: {}]   ;;  %s2492_s13 = inlined_call_operand.vmem [shape: f32[1,32], index: 13, kind: input, shape index: {}]   ;;  %s2493_s14 = inlined_call_operand.vmem [shape: f32[1,32], index: 14, kind: input, shape index: {}]   ;;  %s2494_s15 = inlined_call_operand.vmem [shape: f32[1,32], index: 15, kind: input, shape index: {}]   ;;  %s2495_s16 = inlined_call_operand.vmem [shape: f32[1,32], index: 16, kind: input, shape index: {}]   ;;  %s2496_s17 = inlined_call_operand.hbm [shape: f32[2,16,32], index: 17, kind: output, shape index: {}]  }
   0x1   :  { %2499 = sst [smem:[#allocation15_spill]] %s2479_s0 }
   0x2   :  { %2500 = sst [smem:[#allocation16_spill]] %s2480_s1 }
   0x3   :  { %22 = vsyncpa [#allocation3], 0 }
   0x4   :  { %23 = vsyncpa [#allocation6], 0 }
   0x5   :  { %24 = vsyncpa [#allocation9], 0  ;;  %s51_s26 = sshll.u32 %s2484_s5, 4  ;;  %s52_s26 = int_to_ptr.hbm [resolvable:$true] %s51_s26 }
   0x6   :  { %25 = vsyncpa [#allocation4], 0  ;;  %s1924_s27 = smov [#allocation5]   ;;  %s34_s30 = sshll.u32 %s2481_s2, 4  ;;  %s35_s30 = int_to_ptr.hbm [resolvable:$true] %s34_s30 }
   0x7   :  { %s53_s28 = sshll.u32 %s1924_s27, 4  ;;  %s1925_s18 = smov 128   ;;  %s54_s28 = int_to_ptr.vmem [resolvable:$true] %s53_s28 }
   0x8   :  { %s1926_s19 = smov 8   ;;  %s1927_s1 = smov [#allocation2]  }
   0x9   :  { %59 = dma.hbm_to_vmem [thread:$0]  %s52_s26, 512, %s54_s28, [#allocation6], %s1925_s18, %s1925_s18, %s1926_s19  }
   0xa   :  { %s36_s20 = sshll.u32 %s1927_s1, 4  ;;  %s1928_s5 = smov 16   ;;  %s37_s20 = int_to_ptr.vmem [resolvable:$true] %s36_s20 }
   0xb   :  { %s1929_s21 = smov 1   ;;  %s66_s24 = sshll.u32 %s2486_s7, 4  ;;  %s67_s24 = int_to_ptr.hbm [resolvable:$true] %s66_s24 }
   0xc   :  { %42 = dma.hbm_to_vmem [thread:$0]  %s35_s30, 32, %s37_s20, [#allocation3], %s1928_s5, %s1928_s5, %s1929_s21  }
   0xd   :  { %s1930_s25 = smov [#allocation7]   ;;  %s81_s0 = sshll.u32 %s2488_s9, 4  ;;  %s82_s0 = int_to_ptr.hbm [resolvable:$true] %s81_s0 }
   0xe   :  { %s68_s2 = sshll.u32 %s1930_s25, 4  ;;  %s1931_s26 = smov [#allocation8]   ;;  %s69_s2 = int_to_ptr.vmem [resolvable:$true] %s68_s2 }
   0xf   :  { %74 = dma.hbm_to_vmem [thread:$0]  %s67_s24, 512, %s69_s2, [#allocation6], %s1925_s18, %s1925_s18, %s1926_s19  }
  0x10   :  { %s83_s28 = sshll.u32 %s1931_s26, 4  ;;  %s84_s28 = int_to_ptr.vmem [resolvable:$true] %s83_s28 }
  0x11   :  { %89 = dma.hbm_to_vmem [thread:$0]  %s82_s0, 512, %s84_s28, [#allocation9], %s1925_s18, %s1925_s18, %s1926_s19  }
  0x12   :  { %1916 = dma.done.wait [#allocation3], 32  }
  0x13   :  { %1917 = vsyncadd [#allocation3], 4294967264 }
  0x14   :  { %1918 = dma.done.wait [#allocation6], 1024  }
  0x15   :  { %1919 = vsyncadd [#allocation6], 4294966272 }
  0x16   :  { %1920 = dma.done.wait [#allocation9], 512  }
  0x17   :  { %1921 = vsyncadd [#allocation9], 4294966784  ;;  %v137_v0 = vld [vmem:[%s2482_s3 + $0x18] sm:$0xff]  ;;  %v136_v1 = vld [vmem:[%s2482_s3 + $0x10] sm:$0xff]  ;;  %s2501_s21 = sld [smem:[#allocation15_spill]]  ;;  %vm142_vm0 = vcmask 261120  }
  0x18   :  { %167 = vmatpush.msra.mxu0 %v137_v0  ;;  %s2502_s24 = sld [smem:[#allocation16_spill]]  ;;  %1648 = vmatpush.msra.mxu1 %v137_v0  ;;  %v135_v4 = vld [vmem:[%s2482_s3 + $0x8] sm:$0xff]  ;;  %v134_v7 = vld [vmem:[%s2482_s3] sm:$0xff]  ;;  %s1932_s27 = smov 120   ;;  %v186_v26 = vld [vmem:[#allocation5 + $0x10] sm:$0xff]  ;;  %vm244_vm1 = vcmask 64512  }
  0x19   :  { %v1699_v16 = vld [vmem:[%s2483_s4] ss:$0 sm:$0xff]  ;;  %s1934_s29 = smov 96   ;;  %v185_v27 = vld [vmem:[#allocation5 + $0x8] sm:$0xff]  ;;  %v184_v28 = vld [vmem:[#allocation5] sm:$0xff]  ;;  %vm327_vm2 = vcmask 130048  }
  0x1a   :  { %168 = vmatpush.msra.mxu0 %v136_v1  ;;  %1649 = vmatpush.msra.mxu1 %v136_v1  ;;  %v187_v25 = vld [vmem:[#allocation5 + $0x18] sm:$0xff]  ;;  %s1936_s26 = smov 112   ;;  %s1937_s28 = smov 72  }
  0x1b   :  { %v2139_v37 = vld [vmem:[#allocation2] ss:$0 sm:$0xff]  ;;  %v2172_v62 = vld [vmem:[#allocation2 + $0x1] ss:$0 sm:$0xff]  ;;  %s1938_s7 = smov 104  }
  0x1c   :  { %169 = vmatpush.msra.mxu0 %v135_v4  ;;  %1650 = vmatpush.msra.mxu1 %v135_v4  ;;  %v2146_v43 = vld [vmem:[%s2485_s6] ss:$0 sm:$0xff]  ;;  %s1935_s6 = smov 80  }
  0x1d   :  { %v120_v2 = vld [vmem:[%s2501_s21] sm:$0xff]  ;;  %v2070_v5 = vld [vmem:[%s2501_s21 + $0x10] sm:$0xff]  ;;  %v121_v10 = vld [vmem:[%s2501_s21 + $0x8] sm:$0xff] }
  0x1e   :  { %v124_v3 = vld [vmem:[%s2502_s24] sm:$0xff]  ;;  %v126_v6 = vld [vmem:[%s2502_s24 + $0x10] sm:$0xff]  ;;  %170 = vmatpush.msra.mxu0 %v134_v7  ;;  %1651 = vmatpush.msra.mxu1 %v134_v7  ;;  %v125_v11 = vld [vmem:[%s2502_s24 + $0x8] sm:$0xff] }
  0x1f   :  { %v130_v8 = vadd.f32 %v124_v3, %v120_v2  ;;  %v132_v9 = vadd.f32 %v126_v6, %v2070_v5  ;;  %v123_v12 = vld [vmem:[%s2501_s21 + $0x18] sm:$0xff]  ;;  %v131_v14 = vadd.f32 %v125_v11, %v121_v10 }
  0x20   :  { %v127_v13 = vld [vmem:[%s2502_s24 + $0x18] sm:$0xff]  ;;  %s1933_s24 = smov 88   ;;  %216 = vmatpush.msrb.mxu1 %v187_v25 }
  0x21   :  { %1568 = vmatmul.msk.f32.vlgmr.msra.gmra.mxu0 %vm142_vm0, %v130_v8  ;;  %1570 = vmatmul.msk.f32.vlgmr.msra.gmra.mxu1 %vm142_vm0, %v132_v9  ;;  %v133_v15 = vadd.f32 %v127_v13, %v123_v12 }
  0x22   :  { %217 = vmatpush.msrb.mxu1 %v186_v26 }
  0x24   :  { %218 = vmatpush.msrb.mxu1 %v185_v27 }
  0x26   :  { %219 = vmatpush.msrb.mxu1 %v184_v28 }
  0x29   :  { %1569 = vmatmul.msk.f32.gmra.mxu0 %vm142_vm0, %v131_v14  ;;  %1571 = vmatmul.msk.f32.gmra.mxu1 %vm142_vm0, %v133_v15 }
  0x31   :  { %1572 = vmatmul.msk.f32.vlgmr.msrb.gmra.mxu1 %vm142_vm0, %v120_v2 }
  0x39   :  { %1573 = vmatmul.msk.f32.gmra.mxu1 %vm142_vm0, %v121_v10 }
  0x41   :  { %1574 = vmatmul.msk.f32.gmra.mxu1 %vm142_vm0, %v2070_v5 }
  0x49   :  { %1575 = vmatmul.msk.f32.gmra.mxu1 %vm142_vm0, %v123_v12 }
  0x9e   :  { %v172_v17 = vpop.f32.mrf.mxu0  ;;  %v178_v21 = vpop.f32.mrf.mxu1 }
  0x9f   :  { %v2098_v18 = vadd.f32 %v1699_v16, %v172_v17  ;;  %v2112_v22 = vadd.f32 %v1699_v16, %v178_v21 }
  0xa1   :  { %430 = vrot.lane.b32.xlu2 %v2098_v18, %s1932_s27 }
  0xa6   :  { %v175_v19 = vpop.f32.mrf.mxu0  ;;  %v181_v23 = vpop.f32.mrf.mxu1 }
  0xa7   :  { %v2102_v20 = vadd.f32 %v1699_v16, %v175_v19  ;;  %v2115_v24 = vadd.f32 %v1699_v16, %v181_v23 }
  0xa9   :  { %436 = vrot.lane.b32.xlu1 %v2102_v20, %s1933_s24  ;;  %242 = vrot.lane.b32.xlu0 %v2102_v20, %s1934_s29 }
  0xaa   :  { %432 = vrot.lane.b32.xlu2 %v2102_v20, %s1932_s27 }
  0xae   :  { %v221_v38 = vpop.f32.mrf.mxu1 }
  0xaf   :  { %v222_v52 = vadd.f32 %v2146_v43, %v221_v38 }
  0xb1   :  { %434 = vrot.lane.b32.xlu1 %v2098_v18, %s1933_s24  ;;  %240 = vrot.lane.b32.xlu0 %v2098_v18, %s1934_s29 }
  0xb6   :  { %v224_v47 = vpop.f32.mrf.mxu1 }
  0xb7   :  { %v225_v49 = vadd.f32 %v2146_v43, %v224_v47 }
  0xb9   :  { %278 = vrot.lane.b32.xlu1 %v2112_v22, %s1934_s29  ;;  %280 = vrot.lane.b32.xlu0 %v2115_v24, %s1934_s29  ;;  %v2162_v59 = vpack.i.bf16 %v222_v52, %v225_v49 }
  0xfb   :  { %v431_v33 = vpop.permute.xlu2 %430 }
 0x104   :  { %v433_v34 = vpop.permute.xlu2 %432 }
 0x11b   :  { %v437_v29 = vpop.permute.xlu1 %436  ;;  %v243_v30 = vpop.permute.xlu0 %242 }
 0x11c   :  { %1576 = vmatpush.xpose.msk.msra.mxu2 %vm244_vm1, %v243_v30  ;;  %1588 = vmatpush.xpose.msk.msrb.mxu0 %vm244_vm1, %v437_v29 }
 0x123   :  { %v435_v31 = vpop.permute.xlu1 %434  ;;  %v241_v32 = vpop.permute.xlu0 %240 }
 0x124   :  { %1577 = vmatpush.xpose.msk.msra.mxu2 %vm244_vm1, %v241_v32  ;;  %1589 = vmatpush.xpose.msk.msrb.mxu0 %vm244_vm1, %v435_v31 }
 0x127   :  { %1578 = vmatmul.msk.f32.vlgmr.msra.gmra.mxu2 %vm244_vm1, %v2098_v18  ;;  %1590 = vmatmul.msk.f32.vlgmr.msrb.gmra.mxu0 %vm244_vm1, %v431_v33 }
 0x128   :  { %392 = vmatpush.msrb.mxu2 %v225_v49 }
 0x12a   :  { %393 = vmatpush.msrb.mxu2 %v222_v52 }
 0x12b   :  { %v281_v35 = vpop.permute.xlu0 %280  ;;  %v279_v36 = vpop.permute.xlu1 %278 }
 0x12c   :  { %1580 = vmatpush.xpose.msk.msra.mxu3 %vm244_vm1, %v281_v35 }
 0x12f   :  { %1579 = vmatmul.msk.f32.gmra.mxu2 %vm244_vm1, %v2102_v20  ;;  %1591 = vmatmul.msk.f32.gmra.mxu0 %vm244_vm1, %v433_v34 }
 0x130   :  { %1581 = vmatpush.xpose.msk.msra.mxu3 %vm244_vm1, %v279_v36 }
 0x133   :  { %1582 = vmatmul.msk.f32.vlgmr.msra.gmra.mxu3 %vm244_vm1, %v2112_v22 }
 0x13b   :  { %1583 = vmatmul.msk.f32.gmra.mxu3 %vm244_vm1, %v2115_v24 }
 0x1a4   :  { %v463_v39 = vpop.f32.mrf.mxu0 }
 0x1a5   :  { %v508_v40 = vmul.f32 0.35355338, %v463_v39 }
 0x1a7   :  { %v512_v41 = vadd.f32 %v2139_v37, %v508_v40 }
 0x1a9   :  { %v516_v42 = vsel %vm327_vm2, %v512_v41, -inf }
 0x1aa   :  { %517 = vmax.xlane.f32.xlu1 %v516_v42  ;;  %v270_v44 = vpop.f32.mrf.mxu2 }
 0x1ab   :  { %v313_v45 = vmul.f32 0.35355338, %v270_v44 }
 0x1ac   :  { %v466_v46 = vpop.f32.mrf.mxu0 }
 0x1ad   :  { %v323_v48 = vadd.f32 %v2139_v37, %v313_v45  ;;  %v509_v50 = vmul.f32 0.35355338, %v466_v46 }
 0x1af   :  { %v328_v51 = vsel %vm327_vm2, %v323_v48, -inf  ;;  %v513_v55 = vadd.f32 %v2139_v37, %v509_v50 }
 0x1b0   :  { %329 = vmax.xlane.f32.xlu2 %v328_v51 }
 0x1b1   :  { %v519_v57 = vsel %vm327_vm2, %v513_v55, -inf }
 0x1b2   :  { %v273_v53 = vpop.f32.mrf.mxu2 }
 0x1b3   :  { %v314_v54 = vmul.f32 0.35355338, %v273_v53 }
 0x1b5   :  { %v324_v56 = vadd.f32 %v2139_v37, %v314_v54 }
 0x1b6   :  { %v307_v60 = vpop.f32.mrf.mxu3 }
 0x1b7   :  { %v331_v58 = vsel %vm327_vm2, %v324_v56, -inf  ;;  %v315_v61 = vmul.f32 0.35355338, %v307_v60 }
 0x1b8   :  { %520 = vmax.xlane.f32.xlu2 %v519_v57  ;;  %332 = vmax.xlane.f32.xlu0 %v331_v58 }
 0x1b9   :  { %v325_v63 = vadd.f32 %v2172_v62, %v315_v61 }
 0x1bb   :  { %v334_v0 = vsel %vm327_vm2, %v325_v63, -inf }
 0x1be   :  { %v310_v31 = vpop.f32.mrf.mxu3 }
 0x1bf   :  { %v316_v33 = vmul.f32 0.35355338, %v310_v31 }
 0x1c1   :  { %v326_v35 = vadd.f32 %v2172_v62, %v316_v33 }
 0x1c3   :  { %473 = vrot.lane.b32.xlu1 %v2112_v22, %s1933_s24  ;;  %v337_v38 = vsel %vm327_vm2, %v326_v35, -inf }
 0x1cb   :  { %471 = vrot.lane.b32.xlu1 %v2115_v24, %s1932_s27 }
 0x1cc   :  { %475 = vrot.lane.b32.xlu0 %v2115_v24, %s1933_s24 }
 0x1d3   :  { %1670 = vrot.lane.b32.xlu1 %v2162_v59, %s1932_s27 }
 0x1db   :  { %722 = vrot.lane.b32.xlu1 %v2102_v20, %s1935_s6 }
 0x1e3   :  { %720 = vrot.lane.b32.xlu1 %v2098_v18, %s1935_s6 }
 0x1eb   :  { %716 = vrot.lane.b32.xlu1 %v2098_v18, %s1936_s26 }
 0x215   :  { %335 = vmax.xlane.f32.xlu1 %v334_v0 }
 0x21d   :  { %v518_v1 = vpop.xlane.xlu1 %517 }
 0x21e   :  { %v528_v2 = vsub.f32 %v512_v41, %v518_v1 }
 0x220   :  { %v532_v3 = vmul.f32 1.442695, %v528_v2 }
 0x222   :  { %1710 = vpow2.f32 %v532_v3 }
 0x223   :  { %v330_v4 = vpop.xlane.xlu2 %329 }
 0x224   :  { %v340_v5 = vsub.f32 %v323_v48, %v330_v4 }
 0x226   :  { %v344_v6 = vmul.f32 1.442695, %v340_v5 }
 0x228   :  { %v2176_v7 = vpop.eup %1710  ;;  %1712 = vpow2.f32 %v344_v6 }
 0x229   :  { %v540_v8 = vsel %vm327_vm2, %v2176_v7, 0.0 }
 0x22a   :  { %541 = vadd.xlane.f32.xlu0 %v540_v8 }
 0x22b   :  { %v333_v9 = vpop.xlane.xlu0 %332  ;;  %v521_v26 = vpop.xlane.xlu2 %520 }
 0x22c   :  { %v341_v10 = vsub.f32 %v324_v56, %v333_v9  ;;  %v529_v27 = vsub.f32 %v513_v55, %v521_v26  ;;  %v227_v55 = vpop.f32.mrf.mxu1  ;;  %v233_v9 = vld [vmem:[#allocation7] sm:$0xff] }
 0x22d   :  { %v228_v57 = vadd.f32 %v2146_v43, %v227_v55 }
 0x22e   :  { %v1713_v11 = vpop.eup %1712  ;;  %v346_v12 = vmul.f32 1.442695, %v341_v10  ;;  %v534_v28 = vmul.f32 1.442695, %v529_v27  ;;  %v234_v10 = vld [vmem:[#allocation7 + $0x8] sm:$0xff] }
 0x22f   :  { %v352_v13 = vsel %vm327_vm2, %v1713_v11, 0.0  ;;  %661 = vmatpush.msra.mxu0 %v234_v10 }
 0x230   :  { %353 = vadd.xlane.f32.xlu2 %v352_v13  ;;  %1714 = vpow2.f32 %v346_v12 }
 0x231   :  { %1716 = vpow2.f32 %v534_v28 }
 0x234   :  { %v230_v56 = vpop.f32.mrf.mxu1 }
 0x235   :  { %v474_v14 = vpop.permute.xlu1 %473  ;;  %v231_v58 = vadd.f32 %v2146_v43, %v230_v56 }
 0x236   :  { %v1715_v15 = vpop.eup %1714 }
 0x237   :  { %v355_v16 = vsel %vm327_vm2, %v1715_v15, 0.0  ;;  %v1717_v30 = vpop.eup %1716  ;;  %421 = vmatpush.msrb.mxu3 %v231_v58  ;;  %v2209_v43 = vpack.i.bf16 %v228_v57, %v231_v58 }
 0x238   :  { %356 = vadd.xlane.f32.xlu2 %v355_v16  ;;  %v543_v34 = vsel %vm327_vm2, %v1717_v30, 0.0 }
 0x239   :  { %422 = vmatpush.msrb.mxu3 %v228_v57 }
 0x23d   :  { %v472_v17 = vpop.permute.xlu1 %471 }
 0x23e   :  { %718 = vrot.lane.b32.xlu0 %v2102_v20, %s1936_s26  ;;  %v476_v19 = vpop.permute.xlu0 %475 }
 0x23f   :  { %1592 = vmatpush.xpose.msk.msra.mxu1 %vm244_vm1, %v476_v19 }
 0x243   :  { %1593 = vmatpush.xpose.msk.msra.mxu1 %vm244_vm1, %v474_v14 }
 0x245   :  { %v1671_v21 = vpop.permute.xlu1 %1670 }
 0x246   :  { %v1673_v23 = vunpack.i.h.bf16 %v1671_v21  ;;  %v1672_v25 = vunpack.i.l.bf16 %v1671_v21 }
 0x247   :  { %702 = vmatpush.msrb.mxu1 %v233_v9 }
 0x248   :  { %588 = vmatpush.msra.mxu2 %v1672_v25 }
 0x24a   :  { %589 = vmatpush.msra.mxu2 %v1673_v23 }
 0x24d   :  { %v723_v29 = vpop.permute.xlu1 %722 }
 0x250   :  { %469 = vrot.lane.b32.xlu2 %v2112_v22, %s1932_s27 }
 0x255   :  { %v721_v32 = vpop.permute.xlu1 %720 }
 0x25d   :  { %v717_v36 = vpop.permute.xlu1 %716 }
 0x279   :  { %544 = vadd.xlane.f32.xlu2 %v543_v34 }
 0x281   :  { %338 = vmax.xlane.f32.xlu2 %v337_v38 }
 0x288   :  { %v336_v39 = vpop.xlane.xlu1 %335 }
 0x289   :  { %v342_v40 = vsub.f32 %v325_v63, %v336_v39 }
 0x28b   :  { %v348_v41 = vmul.f32 1.442695, %v342_v40 }
 0x28d   :  { %1718 = vpow2.f32 %v348_v41 }
 0x293   :  { %v1719_v42 = vpop.eup %1718 }
 0x294   :  { %v358_v44 = vsel %vm327_vm2, %v1719_v42, 0.0 }
 0x295   :  { %359 = vadd.xlane.f32.xlu0 %v358_v44 }
 0x29d   :  { %v542_v49 = vpop.xlane.xlu0 %541 }
 0x2a3   :  { %v354_v45 = vpop.xlane.xlu2 %353 }
 0x2a4   :  { %1720 = vrcp.f32 %v354_v45 }
 0x2a9   :  { %761 = vrot.lane.b32.xlu0 %v2115_v24, %s1935_s6 }
 0x2aa   :  { %v1721_v46 = vpop.eup %1720 }
 0x2ab   :  { %v368_v47 = vmul.f32 %v1721_v46, %v1713_v11  ;;  %v357_v48 = vpop.xlane.xlu2 %356 }
 0x2ac   :  { %1722 = vrcp.f32 %v357_v48 }
 0x2ad   :  { %1584 = vmatmul.msk.f32.vlgmr.msrb.gmra.mxu2 %vm327_vm2, %v368_v47  ;;  %1724 = vrcp.f32 %v542_v49 }
 0x2ae   :  { %1608 = vmatpush.xpose.msk.msrb.mxu2 %vm244_vm1, %v723_v29 }
 0x2b0   :  { %v719_v4 = vpop.permute.xlu0 %718 }
 0x2b1   :  { %755 = vrot.lane.b32.xlu0 %v2112_v22, %s1936_s26 }
 0x2b2   :  { %1609 = vmatpush.xpose.msk.msrb.mxu2 %vm244_vm1, %v721_v32  ;;  %v1723_v50 = vpop.eup %1722 }
 0x2b3   :  { %v470_v51 = vpop.permute.xlu2 %469  ;;  %v369_v52 = vmul.f32 %v1723_v50, %v1715_v15  ;;  %v1725_v53 = vpop.eup %1724 }
 0x2b4   :  { %1594 = vmatmul.msk.f32.vlgmr.msra.gmra.mxu1 %vm244_vm1, %v470_v51  ;;  %v556_v54 = vmul.f32 %v1725_v53, %v2176_v7 }
 0x2b5   :  { %1585 = vmatmul.msk.f32.gmra.mxu2 %vm327_vm2, %v369_v52 }
 0x2bc   :  { %1595 = vmatmul.msk.f32.gmra.mxu1 %vm244_vm1, %v472_v17 }
 0x2bd   :  { %1596 = vmatmul.msk.f32.vlgmr.msra.gmra.mxu2 %vm327_vm2, %v556_v54 }
 0x2ec   :  { %v545_v60 = vpop.xlane.xlu2 %544 }
 0x2ed   :  { %1726 = vrcp.f32 %v545_v60 }
 0x2f3   :  { %v1727_v61 = vpop.eup %1726 }
 0x2f4   :  { %v339_v63 = vpop.xlane.xlu2 %338  ;;  %v557_v0 = vmul.f32 %v1727_v61, %v1717_v30 }
 0x2f5   :  { %v343_v1 = vsub.f32 %v326_v35, %v339_v63 }
 0x2f6   :  { %1597 = vmatmul.msk.f32.gmra.mxu2 %vm327_vm2, %v557_v0 }
 0x2f7   :  { %v350_v2 = vmul.f32 1.442695, %v343_v1 }
 0x2f9   :  { %1728 = vpow2.f32 %v350_v2 }
 0x2fe   :  { %1610 = vmatmul.msk.f32.vlgmr.msrb.gmra.mxu2 %vm244_vm1, %v717_v36 }
 0x2ff   :  { %v1729_v3 = vpop.eup %1728 }
 0x300   :  { %v361_v5 = vsel %vm327_vm2, %v1729_v3, 0.0 }
 0x301   :  { %362 = vadd.xlane.f32.xlu2 %v361_v5 }
 0x306   :  { %1611 = vmatmul.msk.f32.gmra.mxu2 %vm244_vm1, %v719_v4 }
 0x308   :  { %v360_v6 = vpop.xlane.xlu0 %359 }
 0x309   :  { %1730 = vrcp.f32 %v360_v6 }
 0x30f   :  { %v1731_v7 = vpop.eup %1730 }
 0x310   :  { %v370_v8 = vmul.f32 %v1731_v7, %v1719_v42 }
 0x312   :  { %1586 = vmatmul.msk.f32.vlgmr.msrb.gmra.mxu3 %vm327_vm2, %v370_v8 }
 0x31b   :  { %v762_v51 = vpop.permute.xlu0 %761 }
 0x323   :  { %v756_v8 = vpop.permute.xlu0 %755 }
 0x330   :  { %v395_v11 = vpop.f32.mrf.mxu2 }
 0x331   :  { %1604 = vmatmul.msk.f32.vlgmr.msrb.gmra.mxu1 %vm244_vm1, %v395_v11  ;;  %v502_v12 = vpop.f32.mrf.mxu1 }
 0x332   :  { %v510_v13 = vmul.f32 0.35355338, %v502_v12 }
 0x334   :  { %v514_v14 = vadd.f32 %v2172_v62, %v510_v13 }
 0x336   :  { %v522_v15 = vsel %vm327_vm2, %v514_v14, -inf }
 0x337   :  { %523 = vmax.xlane.f32.xlu2 %v522_v15 }
 0x338   :  { %v398_v16 = vpop.f32.mrf.mxu2 }
 0x339   :  { %v505_v17 = vpop.f32.mrf.mxu1  ;;  %1605 = vmatmul.msk.f32.gmra.mxu1 %vm244_vm1, %v398_v16 }
 0x33a   :  { %v511_v19 = vmul.f32 0.35355338, %v505_v17 }
 0x33c   :  { %v515_v21 = vadd.f32 %v2172_v62, %v511_v19 }
 0x33e   :  { %v525_v23 = vsel %vm327_vm2, %v515_v21, -inf }
 0x33f   :  { %526 = vmax.xlane.f32.xlu2 %v525_v23 }
 0x340   :  { %v591_v25 = vpop.f32.mrf.mxu2 }
 0x341   :  { %1600 = vmatmul.msk.f32.vlgmr.msra.gmra.mxu0 %vm244_vm1, %v591_v25 }
 0x357   :  { %1675 = vrot.lane.b32.xlu2 %v2209_v43, %s1932_s27 }
 0x35f   :  { %757 = vrot.lane.b32.xlu2 %v2115_v24, %s1936_s26 }
 0x367   :  { %967 = vrot.lane.b32.xlu2 %v2102_v20, %s1937_s28 }
 0x374   :  { %v363_v26 = vpop.xlane.xlu2 %362 }
 0x375   :  { %1732 = vrcp.f32 %v363_v26 }
 0x379   :  { %v594_v27 = vpop.f32.mrf.mxu2 }
 0x37a   :  { %1601 = vmatmul.msk.f32.gmra.mxu0 %vm244_vm1, %v594_v27 }
 0x37b   :  { %v1733_v28 = vpop.eup %1732 }
 0x37c   :  { %v371_v29 = vmul.f32 %v1733_v28, %v1729_v3 }
 0x37e   :  { %1587 = vmatmul.msk.f32.gmra.mxu3 %vm327_vm2, %v371_v29 }
 0x381   :  { %v749_v30 = vpop.f32.mrf.mxu2 }
 0x382   :  { %v794_v52 = vmul.f32 0.35355338, %v749_v30 }
 0x384   :  { %v798_v53 = vadd.f32 %v2139_v37, %v794_v52 }
 0x386   :  { %v802_v55 = vsel %vm327_vm2, %v798_v53, -inf }
 0x389   :  { %v752_v31 = vpop.f32.mrf.mxu2 }
 0x38a   :  { %v795_v32 = vmul.f32 0.35355338, %v752_v31 }
 0x38c   :  { %v799_v33 = vadd.f32 %v2139_v37, %v795_v32 }
 0x38e   :  { %v805_v34 = vsel %vm327_vm2, %v799_v33, -inf }
 0x390   :  { %806 = vmax.xlane.f32.xlu2 %v805_v34 }
 0x395   :  { %v424_v35 = vpop.f32.mrf.mxu3 }
 0x396   :  { %1606 = vmatmul.msk.f32.gmra.mxu1 %vm244_vm1, %v424_v35 }
 0x3a8   :  { %965 = vrot.lane.b32.xlu2 %v2098_v18, %s1937_s28 }
 0x3aa   :  { %v524_v36 = vpop.xlane.xlu2 %523 }
 0x3ab   :  { %v530_v38 = vsub.f32 %v514_v14, %v524_v36 }
 0x3ad   :  { %v536_v39 = vmul.f32 1.442695, %v530_v38 }
 0x3ae   :  { %v2264_v19 = vpop.f32.mrf.mxu1 }
 0x3af   :  { %1734 = vpow2.f32 %v536_v39 }
 0x3b0   :  { %961 = vrot.lane.b32.xlu2 %v2098_v18, %s1938_s7 }
 0x3b2   :  { %v527_v40 = vpop.xlane.xlu2 %526 }
 0x3b3   :  { %v531_v41 = vsub.f32 %v515_v21, %v527_v40 }
 0x3b5   :  { %v1735_v42 = vpop.eup %1734  ;;  %v538_v44 = vmul.f32 1.442695, %v531_v41 }
 0x3b6   :  { %v546_v45 = vsel %vm327_vm2, %v1735_v42, 0.0  ;;  %v2270_v23 = vpop.f32.mrf.mxu1 }
 0x3b7   :  { %1736 = vpow2.f32 %v538_v44  ;;  %547 = vadd.xlane.f32.xlu1 %v546_v45 }
 0x3b8   :  { %963 = vrot.lane.b32.xlu2 %v2102_v20, %s1938_s7 }
 0x3ba   :  { %v1676_v46 = vpop.permute.xlu2 %1675 }
 0x3bb   :  { %v1677_v47 = vunpack.i.l.bf16 %v1676_v46  ;;  %v1678_v49 = vunpack.i.h.bf16 %v1676_v46 }
 0x3bd   :  { %v1737_v48 = vpop.eup %1736  ;;  %625 = vmatpush.msra.mxu3 %v1677_v47 }
 0x3be   :  { %v549_v50 = vsel %vm327_vm2, %v1737_v48, 0.0 }
 0x3bf   :  { %550 = vadd.xlane.f32.xlu1 %v549_v50  ;;  %626 = vmatpush.msra.mxu3 %v1678_v49 }
 0x3c0   :  { %1006 = vrot.lane.b32.xlu2 %v2115_v24, %s1937_s28 }
 0x3c1   :  { %1612 = vmatpush.xpose.msk.msrb.mxu3 %vm244_vm1, %v762_v51 }
 0x3c2   :  { %v758_v18 = vpop.permute.xlu2 %757 }
 0x3c8   :  { %1004 = vrot.lane.b32.xlu2 %v2112_v22, %s1937_s28 }
 0x3ca   :  { %v968_v20 = vpop.permute.xlu2 %967 }
 0x3cb   :  { %1624 = vmatpush.xpose.msk.msra.mxu1 %vm244_vm1, %v968_v20 }
 0x3d0   :  { %1002 = vrot.lane.b32.xlu2 %v2115_v24, %s1938_s7 }
 0x3d8   :  { %759 = vrot.lane.b32.xlu1 %v2112_v22, %s1935_s6 }
 0x401   :  { %v427_v54 = vpop.f32.mrf.mxu3 }
 0x402   :  { %803 = vmax.xlane.f32.xlu1 %v802_v55  ;;  %1607 = vmatmul.msk.f32.gmra.mxu1 %vm244_vm1, %v427_v54 }
 0x403   :  { %v807_v56 = vpop.xlane.xlu2 %806 }
 0x404   :  { %v815_v1 = vsub.f32 %v799_v33, %v807_v56 }
 0x406   :  { %v820_v2 = vmul.f32 1.442695, %v815_v1 }
 0x40b   :  { %v966_v57 = vpop.permute.xlu2 %965 }
 0x40c   :  { %1625 = vmatpush.xpose.msk.msra.mxu1 %vm244_vm1, %v966_v57 }
 0x413   :  { %v962_v58 = vpop.permute.xlu2 %961  ;;  %v2272_v25 = vpop.f32.mrf.mxu1 }
 0x414   :  { %1626 = vmatmul.msk.f32.vlgmr.msra.gmra.mxu1 %vm244_vm1, %v962_v58 }
 0x41b   :  { %1680 = vrot.lane.b32.xlu1 %v2162_v59, %s1936_s26  ;;  %v964_v24 = vpop.permute.xlu2 %963 }
 0x41c   :  { %1627 = vmatmul.msk.f32.gmra.mxu1 %vm244_vm1, %v964_v24 }
 0x423   :  { %v1007_v14 = vpop.permute.xlu2 %1006 }
 0x42a   :  { %v548_v60 = vpop.xlane.xlu1 %547 }
 0x42b   :  { %1738 = vrcp.f32 %v548_v60  ;;  %v1005_v21 = vpop.permute.xlu2 %1004 }
 0x431   :  { %v1739_v61 = vpop.eup %1738 }
 0x432   :  { %v558_v63 = vmul.f32 %v1739_v61, %v1735_v42  ;;  %v551_v0 = vpop.xlane.xlu1 %550 }
 0x433   :  { %1740 = vrcp.f32 %v551_v0 }
 0x434   :  { %1598 = vmatmul.msk.f32.vlgmr.msra.gmra.mxu3 %vm327_vm2, %v558_v63  ;;  %1742 = vpow2.f32 %v820_v2 }
 0x439   :  { %v1741_v3 = vpop.eup %1740 }
 0x43a   :  { %v559_v4 = vmul.f32 %v1741_v3, %v1737_v48  ;;  %v1743_v5 = vpop.eup %1742 }
 0x43b   :  { %v829_v6 = vsel %vm327_vm2, %v1743_v5, 0.0 }
 0x43c   :  { %1599 = vmatmul.msk.f32.gmra.mxu3 %vm327_vm2, %v559_v4 }
 0x445   :  { %830 = vadd.xlane.f32.xlu1 %v829_v6 }
 0x44a   :  { %v760_v7 = vpop.permute.xlu1 %759 }
 0x44b   :  { %1613 = vmatpush.xpose.msk.msrb.mxu3 %vm244_vm1, %v760_v7 }
 0x44e   :  { %1614 = vmatmul.msk.f32.vlgmr.msrb.gmra.mxu3 %vm244_vm1, %v756_v8  ;;  %v235_v8 = vld [vmem:[#allocation7 + $0x10] sm:$0xff] }
 0x44f   :  { %943 = vmatpush.msrb.mxu0 %v235_v8 }
 0x456   :  { %1615 = vmatmul.msk.f32.gmra.mxu3 %vm244_vm1, %v758_v18  ;;  %v1003_v18 = vpop.permute.xlu2 %1002 }
 0x475   :  { %v804_v9 = vpop.xlane.xlu1 %803 }
 0x476   :  { %v814_v10 = vsub.f32 %v798_v53, %v804_v9 }
 0x478   :  { %v818_v11 = vmul.f32 1.442695, %v814_v10 }
 0x47a   :  { %1744 = vpow2.f32 %v818_v11 }
 0x47f   :  { %v2274_v26 = vpop.f32.mrf.mxu1 }
 0x480   :  { %v1745_v12 = vpop.eup %1744 }
 0x481   :  { %v826_v13 = vsel %vm327_vm2, %v1745_v12, 0.0 }
 0x482   :  { %827 = vadd.xlane.f32.xlu0 %v826_v13 }
 0x48d   :  { %v1681_v15 = vpop.permute.xlu1 %1680 }
 0x48e   :  { %v1682_v16 = vunpack.i.l.bf16 %v1681_v15  ;;  %v1683_v17 = vunpack.i.h.bf16 %v1681_v15 }
 0x490   :  { %872 = vmatpush.msra.mxu2 %v1682_v16 }
 0x491   :  { %v994_v27 = vpop.f32.mrf.mxu1 }
 0x492   :  { %873 = vmatpush.msra.mxu2 %v1683_v17  ;;  %v1039_v28 = vmul.f32 0.35355338, %v994_v27 }
 0x494   :  { %1628 = vmatpush.xpose.msk.msrb.mxu2 %vm244_vm1, %v1007_v14  ;;  %v1043_v30 = vadd.f32 %v2139_v37, %v1039_v28 }
 0x496   :  { %1000 = vrot.lane.b32.xlu0 %v2112_v22, %s1938_s7  ;;  %v1047_v32 = vsel %vm327_vm2, %v1043_v30, -inf }
 0x498   :  { %1629 = vmatpush.xpose.msk.msrb.mxu2 %vm244_vm1, %v1005_v21 }
 0x499   :  { %v997_v34 = vpop.f32.mrf.mxu1 }
 0x49a   :  { %v1040_v36 = vmul.f32 0.35355338, %v997_v34 }
 0x49c   :  { %v1044_v41 = vadd.f32 %v2139_v37, %v1040_v36 }
 0x49e   :  { %v1050_v44 = vsel %vm327_vm2, %v1044_v41, -inf }
 0x4b7   :  { %v628_v29 = vpop.f32.mrf.mxu3 }
 0x4b8   :  { %1602 = vmatmul.msk.f32.gmra.mxu0 %vm244_vm1, %v628_v29  ;;  %v831_v47 = vpop.xlane.xlu1 %830 }
 0x4bf   :  { %v631_v31 = vpop.f32.mrf.mxu3 }
 0x4c0   :  { %1048 = vmax.xlane.f32.xlu0 %v1047_v32  ;;  %1603 = vmatmul.msk.f32.gmra.mxu0 %vm244_vm1, %v631_v31 }
 0x4d1   :  { %v788_v22 = vpop.f32.mrf.mxu3 }
 0x4d2   :  { %v796_v33 = vmul.f32 0.35355338, %v788_v22 }
 0x4d4   :  { %v800_v35 = vadd.f32 %v2172_v62, %v796_v33 }
 0x4d6   :  { %v808_v38 = vsel %vm327_vm2, %v800_v35, -inf }
 0x4d7   :  { %809 = vmax.xlane.f32.xlu1 %v808_v38 }
 0x4d9   :  { %v791_v39 = vpop.f32.mrf.mxu3 }
 0x4da   :  { %v797_v40 = vmul.f32 0.35355338, %v791_v39 }
 0x4dc   :  { %v801_v42 = vadd.f32 %v2172_v62, %v797_v40 }
 0x4de   :  { %v811_v45 = vsel %vm327_vm2, %v801_v42, -inf }
 0x4df   :  { %1051 = vmax.xlane.f32.xlu1 %v1050_v44  ;;  %812 = vmax.xlane.f32.xlu2 %v811_v45 }
 0x4f5   :  { %v828_v46 = vpop.xlane.xlu0 %827 }
 0x4f6   :  { %1746 = vrcp.f32 %v828_v46 }
 0x4f7   :  { %1748 = vrcp.f32 %v831_v47 }
 0x4fc   :  { %v1747_v48 = vpop.eup %1746 }
 0x4fd   :  { %v842_v49 = vmul.f32 %v1747_v48, %v1745_v12  ;;  %v1749_v50 = vpop.eup %1748 }
 0x4fe   :  { %v843_v51 = vmul.f32 %v1749_v50, %v1743_v5 }
 0x4ff   :  { %1616 = vmatmul.msk.f32.vlgmr.msra.gmra.mxu2 %vm327_vm2, %v842_v49 }
 0x507   :  { %1617 = vmatmul.msk.f32.gmra.mxu2 %vm327_vm2, %v843_v51 }
 0x508   :  { %v1001_v37 = vpop.permute.xlu0 %1000 }
 0x50f   :  { %1630 = vmatmul.msk.f32.vlgmr.msrb.gmra.mxu2 %vm244_vm1, %v1001_v37 }
 0x517   :  { %1631 = vmatmul.msk.f32.gmra.mxu2 %vm244_vm1, %v1003_v18 }
 0x533   :  { %v1049_v20 = vpop.xlane.xlu0 %1048 }
 0x534   :  { %v1059_v52 = vsub.f32 %v1043_v30, %v1049_v20 }
 0x536   :  { %v1063_v53 = vmul.f32 1.442695, %v1059_v52 }
 0x538   :  { %1750 = vpow2.f32 %v1063_v53 }
 0x53e   :  { %v2290_v54 = vpop.eup %1750 }
 0x53f   :  { %v1071_v55 = vsel %vm327_vm2, %v2290_v54, 0.0 }
 0x540   :  { %1072 = vadd.xlane.f32.xlu0 %v1071_v55 }
 0x54a   :  { %v810_v56 = vpop.xlane.xlu1 %809 }
 0x54b   :  { %v816_v57 = vsub.f32 %v800_v35, %v810_v56 }
 0x54d   :  { %v822_v58 = vmul.f32 1.442695, %v816_v57 }
 0x54f   :  { %1752 = vpow2.f32 %v822_v58 }
 0x552   :  { %v1052_v24 = vpop.xlane.xlu1 %1051  ;;  %v813_v60 = vpop.xlane.xlu2 %812 }
 0x553   :  { %v1060_v61 = vsub.f32 %v1044_v41, %v1052_v24  ;;  %v817_v63 = vsub.f32 %v801_v42, %v813_v60 }
 0x555   :  { %v2294_v0 = vpop.eup %1752  ;;  %v1065_v1 = vmul.f32 1.442695, %v1060_v61  ;;  %v824_v2 = vmul.f32 1.442695, %v817_v63 }
 0x556   :  { %v832_v3 = vsel %vm327_vm2, %v2294_v0, 0.0 }
 0x557   :  { %1754 = vpow2.f32 %v1065_v1  ;;  %833 = vadd.xlane.f32.xlu1 %v832_v3  ;;  %v663_v3 = vpop.f32.mrf.mxu0 }
 0x558   :  { %1756 = vpow2.f32 %v824_v2  ;;  %v705_v8 = vadd.f32 %v2264_v19, %v663_v3 }
 0x55d   :  { %v2298_v4 = vpop.eup %1754 }
 0x55e   :  { %v2300_v5 = vpop.eup %1756  ;;  %v1074_v6 = vsel %vm327_vm2, %v2298_v4, 0.0 }
 0x55f   :  { %v835_v7 = vsel %vm327_vm2, %v2300_v5, 0.0  ;;  %1075 = vadd.xlane.f32.xlu0 %v1074_v6 }
 0x560   :  { %836 = vadd.xlane.f32.xlu2 %v835_v7 }
 0x573   :  { %1695 = vrot.lane.b32.xlu0 %v2209_v43, %s1938_s7 }
 0x578   :  { %1690 = vrot.lane.b32.xlu2 %v2162_v59, %s1938_s7 }
 0x582   :  { %v875_v9 = vpop.f32.mrf.mxu2 }
 0x583   :  { %1620 = vmatmul.msk.f32.vlgmr.msrb.gmra.mxu0 %vm244_vm1, %v875_v9 }
 0x58a   :  { %v878_v10 = vpop.f32.mrf.mxu2 }
 0x58b   :  { %1621 = vmatmul.msk.f32.gmra.mxu0 %vm244_vm1, %v878_v10  ;;  %v1703_v10 = vld [vmem:[%s2487_s8] ss:$0 sm:$0xff] }
 0x592   :  { %v1033_v11 = vpop.f32.mrf.mxu2 }
 0x593   :  { %v1041_v12 = vmul.f32 0.35355338, %v1033_v11 }
 0x595   :  { %v1045_v13 = vadd.f32 %v2172_v62, %v1041_v12 }
 0x597   :  { %v1053_v14 = vsel %vm327_vm2, %v1045_v13, -inf }
 0x598   :  { %1054 = vmax.xlane.f32.xlu1 %v1053_v14 }
 0x59a   :  { %v1036_v15 = vpop.f32.mrf.mxu2 }
 0x59b   :  { %v1042_v16 = vmul.f32 0.35355338, %v1036_v15 }
 0x59d   :  { %v1046_v17 = vadd.f32 %v2172_v62, %v1042_v16  ;;  %v1792_v16 = vld [vmem:[%s2501_s21] sm:$0xff] }
 0x59f   :  { %v1056_v21 = vsel %vm327_vm2, %v1046_v17, -inf }
 0x5a0   :  { %1057 = vmax.xlane.f32.xlu1 %v1056_v21 }
 0x5b3   :  { %v1073_v59 = vpop.xlane.xlu0 %1072 }
 0x5b9   :  { %1685 = vrot.lane.b32.xlu1 %v2209_v43, %s1936_s26 }
 0x5ca   :  { %v834_v31 = vpop.xlane.xlu1 %833 }
 0x5d2   :  { %v1076_v27 = vpop.xlane.xlu0 %1075 }
 0x5d3   :  { %v837_v40 = vpop.xlane.xlu2 %836 }
 0x5db   :  { %v1691_v45 = vpop.permute.xlu2 %1690 }
 0x5dc   :  { %v1692_v48 = vunpack.i.l.bf16 %v1691_v45  ;;  %v1693_v49 = vunpack.i.h.bf16 %v1691_v45 }
 0x5e5   :  { %v1696_v28 = vpop.permute.xlu0 %1695 }
 0x5e6   :  { %v1697_v29 = vunpack.i.l.bf16 %v1696_v28  ;;  %v1698_v30 = vunpack.i.h.bf16 %v1696_v28 }
 0x5e8   :  { %1152 = vmatpush.msrb.mxu1 %v1697_v29  ;;  %v1793_v29 = vld [vmem:[%s2501_s21 + $0x8] sm:$0xff] }
 0x5ea   :  { %1153 = vmatpush.msrb.mxu1 %v1698_v30 }
 0x60b   :  { %v1055_v32 = vpop.xlane.xlu1 %1054 }
 0x60c   :  { %v1061_v22 = vsub.f32 %v1045_v13, %v1055_v32 }
 0x60e   :  { %v1067_v33 = vmul.f32 1.442695, %v1061_v22 }
 0x610   :  { %1758 = vpow2.f32 %v1067_v33 }
 0x613   :  { %v1058_v34 = vpop.xlane.xlu1 %1057 }
 0x614   :  { %v1062_v62 = vsub.f32 %v1046_v17, %v1058_v34 }
 0x616   :  { %v1759_v35 = vpop.eup %1758  ;;  %v1069_v36 = vmul.f32 1.442695, %v1062_v62 }
 0x617   :  { %v1077_v38 = vsel %vm327_vm2, %v1759_v35, 0.0 }
 0x618   :  { %1760 = vpow2.f32 %v1069_v36  ;;  %1078 = vadd.xlane.f32.xlu1 %v1077_v38  ;;  %v1794_v38 = vld [vmem:[%s2501_s21 + $0x10] sm:$0xff] }
 0x619   :  { %1762 = vrcp.f32 %v834_v31 }
 0x61a   :  { %1764 = vrcp.f32 %v837_v40 }
 0x61b   :  { %1766 = vrcp.f32 %v1073_v59 }
 0x61c   :  { %1768 = vrcp.f32 %v1076_v27 }
 0x61e   :  { %v1761_v43 = vpop.eup %1760 }
 0x61f   :  { %v1080_v39 = vsel %vm327_vm2, %v1761_v43, 0.0  ;;  %v1763_v42 = vpop.eup %1762 }
 0x620   :  { %1081 = vadd.xlane.f32.xlu2 %v1080_v39  ;;  %v844_v47 = vmul.f32 %v1763_v42, %v2294_v0  ;;  %v1765_v50 = vpop.eup %1764 }
 0x621   :  { %v845_v51 = vmul.f32 %v1765_v50, %v2300_v5  ;;  %v1767_v37 = vpop.eup %1766 }
 0x622   :  { %v1087_v18 = vmul.f32 %v1767_v37, %v2290_v54  ;;  %v1769_v20 = vpop.eup %1768  ;;  %v236_v54 = vld [vmem:[#allocation7 + $0x18] sm:$0xff] }
 0x623   :  { %v1088_v52 = vmul.f32 %v1769_v20, %v2298_v4  ;;  %1188 = vmatpush.msra.mxu2 %v236_v54  ;;  %v666_v4 = vpop.f32.mrf.mxu0 }
 0x624   :  { %v708_v15 = vadd.f32 %v2270_v23, %v666_v4 }
 0x62b   :  { %v1686_v41 = vpop.permute.xlu1 %1685  ;;  %v669_v5 = vpop.f32.mrf.mxu0 }
 0x62c   :  { %v1687_v44 = vunpack.i.l.bf16 %v1686_v41  ;;  %v1688_v46 = vunpack.i.h.bf16 %v1686_v41  ;;  %v711_v32 = vadd.f32 %v2272_v25, %v669_v5  ;;  %v1795_v25 = vld [vmem:[%s2501_s21 + $0x18] sm:$0xff] }
 0x62e   :  { %907 = vmatpush.msra.mxu3 %v1687_v44 }
 0x630   :  { %908 = vmatpush.msra.mxu3 %v1688_v46 }
 0x631   :  { %1618 = vmatmul.msk.f32.vlgmr.msra.gmra.mxu3 %vm327_vm2, %v844_v47 }
 0x632   :  { %1117 = vmatpush.msrb.mxu3 %v1692_v48 }
 0x633   :  { %v672_v6 = vpop.f32.mrf.mxu0 }
 0x634   :  { %1118 = vmatpush.msrb.mxu3 %v1693_v49  ;;  %v714_v36 = vadd.f32 %v2274_v26, %v672_v6  ;;  %v1939_v26 = vmov 32.0  }
 0x639   :  { %1619 = vmatmul.msk.f32.gmra.mxu3 %vm327_vm2, %v845_v51 }
 0x63b   :  { %v945_v7 = vpop.f32.mrf.mxu0 }
 0x63c   :  { %v957_v9 = vadd.f32 %v945_v7, %v705_v8  ;;  %v1331_v7 = vld [vmem:[#allocation8 + $0x18] sm:$0xff]  ;;  %v1330_v8 = vld [vmem:[#allocation8 + $0x10] sm:$0xff] }
 0x63d   :  { %1360 = vmatpush.msra.mxu3 %v1331_v7 }
 0x63f   :  { %1361 = vmatpush.msra.mxu3 %v1330_v8 }
 0x641   :  { %1632 = vmatmul.msk.f32.vlgmr.msrb.gmra.mxu3 %vm327_vm2, %v1087_v18 }
 0x643   :  { %v948_v14 = vpop.f32.mrf.mxu0 }
 0x644   :  { %v958_v21 = vadd.f32 %v948_v14, %v708_v15 }
 0x649   :  { %1633 = vmatmul.msk.f32.gmra.mxu3 %vm327_vm2, %v1088_v52 }
 0x68b   :  { %v1079_v53 = vpop.xlane.xlu1 %1078 }
 0x68c   :  { %1770 = vrcp.f32 %v1079_v53 }
 0x692   :  { %v1771_v55 = vpop.eup %1770 }
 0x693   :  { %v1089_v56 = vmul.f32 %v1771_v55, %v1759_v35  ;;  %v1082_v57 = vpop.xlane.xlu2 %1081 }
 0x694   :  { %1772 = vrcp.f32 %v1082_v57 }
 0x695   :  { %1634 = vmatmul.msk.f32.vlgmr.msrb.gmra.mxu1 %vm327_vm2, %v1089_v56  ;;  %1774 = vrcp.f32 %v1939_v26  ;;  %v1386_v26 = vld [vmem:[%s2490_s11 + $0x28] sm:$0xff] }
 0x69a   :  { %v1773_v58 = vpop.eup %1772 }
 0x69b   :  { %v1090_v24 = vmul.f32 %v1773_v58, %v1761_v43  ;;  %v1775_v47 = vpop.eup %1774 }
 0x69c   :  { %v1232_v48 = vmul.f32 32.0, %v1775_v47  ;;  %vm1236_vm3 = vweird.f32 %v1775_v47 }
 0x69d   :  { %1635 = vmatmul.msk.f32.gmra.mxu1 %vm327_vm2, %v1090_v24 }
 0x69e   :  { %v1233_v49 = vsub.f32 1.0, %v1232_v48 }
 0x6a0   :  { %v1234_v50 = vmul.f32 %v1775_v47, %v1233_v49  ;;  %v1385_v49 = vld [vmem:[%s2490_s11 + $0x20] sm:$0xff] }
 0x6a2   :  { %v1235_v51 = vadd.f32 %v1775_v47, %v1234_v50 }
 0x6a4   :  { %v2359_v37 = vsel %vm1236_vm3, %v1775_v47, %v1235_v51 }
 0x6b4   :  { %v910_v60 = vpop.f32.mrf.mxu3 }
 0x6b5   :  { %1622 = vmatmul.msk.f32.gmra.mxu0 %vm244_vm1, %v910_v60 }
 0x6bc   :  { %v913_v61 = vpop.f32.mrf.mxu3 }
 0x6bd   :  { %1623 = vmatmul.msk.f32.gmra.mxu0 %vm244_vm1, %v913_v61 }
 0x6c4   :  { %v1120_v63 = vpop.f32.mrf.mxu3 }
 0x6c5   :  { %1636 = vmatmul.msk.f32.vlgmr.msra.gmra.mxu2 %vm244_vm1, %v1120_v63 }
 0x6cc   :  { %v1123_v0 = vpop.f32.mrf.mxu3 }
 0x6cd   :  { %1637 = vmatmul.msk.f32.gmra.mxu2 %vm244_vm1, %v1123_v0 }
 0x712   :  { %v1155_v1 = vpop.f32.mrf.mxu1 }
 0x713   :  { %1638 = vmatmul.msk.f32.gmra.mxu2 %vm244_vm1, %v1155_v1 }
 0x71a   :  { %v1158_v2 = vpop.f32.mrf.mxu1 }
 0x71b   :  { %1639 = vmatmul.msk.f32.gmra.mxu2 %vm244_vm1, %v1158_v2  ;;  %vm1393_vm1 = vcmask 523264  }
 0x732   :  { %v951_v23 = vpop.f32.mrf.mxu0 }
 0x733   :  { %v959_v22 = vadd.f32 %v951_v23, %v711_v32 }
 0x73a   :  { %v954_v35 = vpop.f32.mrf.mxu0 }
 0x73b   :  { %v960_v39 = vadd.f32 %v954_v35, %v714_v36 }
 0x748   :  { %v1190_v11 = vpop.f32.mrf.mxu2 }
 0x749   :  { %v1202_v12 = vadd.f32 %v1190_v11, %v957_v9  ;;  %v1329_v9 = vld [vmem:[#allocation8 + $0x8] sm:$0xff] }
 0x74a   :  { %1362 = vmatpush.msra.mxu3 %v1329_v9  ;;  %v1382_v9 = vld [vmem:[%s2490_s11 + $0x8] sm:$0xff] }
 0x74b   :  { %v1209_v13 = vadd.f32 %v1703_v10, %v1202_v12 }
 0x74d   :  { %v1213_v17 = vadd.f32 %v1792_v16, %v1209_v13 }
 0x74f   :  { %v1219_v59 = vsel %vm142_vm0, %v1213_v17, 0.0 }
 0x750   :  { %1220 = vadd.xlane.f32.xlu0 %v1219_v59  ;;  %v1193_v19 = vpop.f32.mrf.mxu2 }
 0x751   :  { %v1203_v27 = vadd.f32 %v1193_v19, %v958_v21 }
 0x753   :  { %v1210_v28 = vadd.f32 %v1703_v10, %v1203_v27 }
 0x755   :  { %v1214_v30 = vadd.f32 %v1793_v29, %v1210_v28 }
 0x757   :  { %v1222_v31 = vsel %vm142_vm0, %v1214_v30, 0.0 }
 0x758   :  { %1223 = vadd.xlane.f32.xlu1 %v1222_v31  ;;  %v2382_v31 = vld [vmem:[%s2492_s13] ss:$0 sm:$0xff]  ;;  %s1553_s13 = sshll.u32 %s2496_s17, 4  ;;  %s1554_s13 = int_to_ptr.hbm [resolvable:$true] %s1553_s13 }
 0x796   :  { %v1196_v33 = vpop.f32.mrf.mxu2 }
 0x797   :  { %v1204_v34 = vadd.f32 %v1196_v33, %v959_v22  ;;  %v1705_v33 = vld [vmem:[%s2493_s14] ss:$0 sm:$0xff] }
 0x799   :  { %v1211_v62 = vadd.f32 %v1703_v10, %v1204_v34 }
 0x79b   :  { %v1215_v43 = vadd.f32 %v1794_v38, %v1211_v62 }
 0x79d   :  { %v1225_v40 = vsel %vm142_vm0, %v1215_v43, 0.0 }
 0x79e   :  { %1226 = vadd.xlane.f32.xlu1 %v1225_v40  ;;  %v1199_v41 = vpop.f32.mrf.mxu2 }
 0x79f   :  { %v1205_v42 = vadd.f32 %v1199_v41, %v960_v39 }
 0x7a1   :  { %v1212_v44 = vadd.f32 %v1703_v10, %v1205_v42  ;;  %v1328_v10 = vld [vmem:[#allocation8] sm:$0xff] }
 0x7a2   :  { %1363 = vmatpush.msra.mxu3 %v1328_v10  ;;  %v1381_v10 = vld [vmem:[%s2490_s11] sm:$0xff] }
 0x7a3   :  { %v1216_v45 = vadd.f32 %v1795_v25, %v1212_v44 }
 0x7a5   :  { %v1228_v46 = vsel %vm142_vm0, %v1216_v45, 0.0 }
 0x7a6   :  { %1229 = vadd.xlane.f32.xlu2 %v1228_v46  ;;  %v1387_v46 = vld [vmem:[%s2490_s11 + $0x30] sm:$0xff] }
 0x7c3   :  { %v1221_v18 = vpop.xlane.xlu0 %1220 }
 0x7c4   :  { %v1238_v20 = vmul.f32 %v2359_v37, %v1221_v18  ;;  %v1384_v18 = vld [vmem:[%s2490_s11 + $0x18] sm:$0xff] }
 0x7c6   :  { %v1242_v52 = vsub.f32 %v1213_v17, %v1238_v20 }
 0x7c8   :  { %v1246_v53 = vmul.f32 %v1242_v52, %v1242_v52 }
 0x7ca   :  { %v1250_v55 = vsel %vm142_vm0, %v1246_v53, 0.0 }
 0x7cb   :  { %v1224_v56 = vpop.xlane.xlu1 %1223  ;;  %1251 = vadd.xlane.f32.xlu1 %v1250_v55 }
 0x7cc   :  { %v1239_v57 = vmul.f32 %v2359_v37, %v1224_v56 }
 0x7ce   :  { %v1243_v58 = vsub.f32 %v1214_v30, %v1239_v57 }
 0x7d0   :  { %v1247_v24 = vmul.f32 %v1243_v58, %v1243_v58 }
 0x7d2   :  { %v1253_v54 = vsel %vm142_vm0, %v1247_v24, 0.0 }
 0x7d3   :  { %1254 = vadd.xlane.f32.xlu2 %v1253_v54 }
 0x811   :  { %v1227_v60 = vpop.xlane.xlu1 %1226 }
 0x812   :  { %v1240_v61 = vmul.f32 %v2359_v37, %v1227_v60 }
 0x814   :  { %v2366_v63 = vsub.f32 %v1215_v43, %v1240_v61 }
 0x816   :  { %v1248_v0 = vmul.f32 %v2366_v63, %v2366_v63 }
 0x818   :  { %v1256_v1 = vsel %vm142_vm0, %v1248_v0, 0.0 }
 0x819   :  { %1257 = vadd.xlane.f32.xlu0 %v1256_v1  ;;  %v1230_v2 = vpop.xlane.xlu2 %1229 }
 0x81a   :  { %v1241_v3 = vmul.f32 %v2359_v37, %v1230_v2 }
 0x81c   :  { %v2372_v4 = vsub.f32 %v1216_v45, %v1241_v3  ;;  %v1388_v45 = vld [vmem:[%s2490_s11 + $0x38] sm:$0xff] }
 0x81d   :  { %1414 = vmatpush.msra.mxu0 %v1388_v45 }
 0x81e   :  { %v1249_v5 = vmul.f32 %v2372_v4, %v2372_v4 }
 0x81f   :  { %1415 = vmatpush.msra.mxu0 %v1387_v46 }
 0x820   :  { %v1259_v6 = vsel %vm142_vm0, %v1249_v5, 0.0 }
 0x821   :  { %1260 = vadd.xlane.f32.xlu1 %v1259_v6  ;;  %1416 = vmatpush.msra.mxu0 %v1386_v26 }
 0x823   :  { %1417 = vmatpush.msra.mxu0 %v1385_v49 }
 0x825   :  { %1418 = vmatpush.msra.mxu0 %v1384_v18 }
 0x83e   :  { %v1252_v11 = vpop.xlane.xlu1 %1251 }
 0x83f   :  { %v1262_v12 = vmul.f32 %v1252_v11, %v2359_v37 }
 0x841   :  { %v1266_v13 = vadd.f32 1e-05, %v1262_v12 }
 0x843   :  { %1776 = vrsqrt.f32 %v1266_v13  ;;  %vm1276_vm5 = vweird.f32 %v1266_v13 }
 0x846   :  { %v1255_v14 = vpop.xlane.xlu2 %1254 }
 0x847   :  { %v1263_v15 = vmul.f32 %v1255_v14, %v2359_v37 }
 0x849   :  { %v1777_v16 = vpop.eup %1776  ;;  %v1267_v17 = vadd.f32 1e-05, %v1263_v15 }
 0x84a   :  { %v1271_v21 = vmul.f32 %v1777_v16, %v1266_v13  ;;  %vm1277_vm4 = vweird.f32 %v1777_v16 }
 0x84b   :  { %1778 = vrsqrt.f32 %v1267_v17  ;;  %vm1278_vm6 = vmor %vm1276_vm5, %vm1277_vm4  ;;  %vm1286_vm8 = vweird.f32 %v1267_v17 }
 0x84c   :  { %v1272_v59 = vmul.f32 %v1777_v16, %v1271_v21 }
 0x84e   :  { %v1273_v19 = vmul.f32 0.5, %v1272_v59 }
 0x850   :  { %v1274_v27 = vsub.f32 1.5, %v1273_v19 }
 0x851   :  { %v1779_v28 = vpop.eup %1778 }
 0x852   :  { %v1275_v29 = vmul.f32 %v1777_v16, %v1274_v27  ;;  %v1281_v30 = vmul.f32 %v1779_v28, %v1267_v17  ;;  %vm1287_vm7 = vweird.f32 %v1779_v28 }
 0x853   :  { %vm1288_vm9 = vmor %vm1286_vm8, %vm1287_vm7 }
 0x854   :  { %v1279_v23 = vsel %vm1278_vm6, %v1777_v16, %v1275_v29  ;;  %v1282_v32 = vmul.f32 %v1779_v28, %v1281_v30  ;;  %v1707_v29 = vld [vmem:[%s2491_s12] ss:$0 sm:$0xff] }
 0x855   :  { %v1310_v22 = vmul.f32 %v1279_v23, %v1242_v52 }
 0x856   :  { %v1283_v34 = vmul.f32 0.5, %v1282_v32 }
 0x857   :  { %v1317_v62 = vmul.f32 %v2382_v31, %v1310_v22 }
 0x858   :  { %v1284_v35 = vsub.f32 1.5, %v1283_v34 }
 0x859   :  { %v2388_v36 = vadd.f32 %v1705_v33, %v1317_v62 }
 0x85a   :  { %v1285_v38 = vmul.f32 %v1779_v28, %v1284_v35 }
 0x85b   :  { %1640 = vmatmul.msk.f32.vlgmr.msra.gmra.mxu3 %vm142_vm0, %v2388_v36 }
 0x85c   :  { %v1289_v43 = vsel %vm1288_vm9, %v1779_v28, %v1285_v38 }
 0x85d   :  { %v1311_v39 = vmul.f32 %v1289_v43, %v1243_v58 }
 0x85f   :  { %v1318_v40 = vmul.f32 %v2382_v31, %v1311_v39 }
 0x861   :  { %v2393_v41 = vadd.f32 %v1705_v33, %v1318_v40 }
 0x863   :  { %1641 = vmatmul.msk.f32.gmra.mxu3 %vm142_vm0, %v2393_v41 }
 0x88c   :  { %v1258_v42 = vpop.xlane.xlu0 %1257 }
 0x88d   :  { %v1264_v44 = vmul.f32 %v1258_v42, %v2359_v37 }
 0x88f   :  { %v1268_v25 = vadd.f32 1e-05, %v1264_v44 }
 0x891   :  { %1780 = vrsqrt.f32 %v1268_v25  ;;  %vm1296_vm11 = vweird.f32 %v1268_v25 }
 0x894   :  { %v1261_v47 = vpop.xlane.xlu1 %1260 }
 0x895   :  { %v1265_v48 = vmul.f32 %v1261_v47, %v2359_v37 }
 0x897   :  { %v1781_v50 = vpop.eup %1780  ;;  %v1269_v51 = vadd.f32 1e-05, %v1265_v48 }
 0x898   :  { %v1291_v20 = vmul.f32 %v1781_v50, %v1268_v25  ;;  %vm1297_vm10 = vweird.f32 %v1781_v50 }
 0x899   :  { %1782 = vrsqrt.f32 %v1269_v51  ;;  %vm1298_vm12 = vmor %vm1296_vm11, %vm1297_vm10  ;;  %vm1306_vm14 = vweird.f32 %v1269_v51 }
 0x89a   :  { %v1292_v52 = vmul.f32 %v1781_v50, %v1291_v20 }
 0x89c   :  { %v1293_v53 = vmul.f32 0.5, %v1292_v52 }
 0x89e   :  { %v1294_v55 = vsub.f32 1.5, %v1293_v53 }
 0x89f   :  { %v1783_v56 = vpop.eup %1782 }
 0x8a0   :  { %v1295_v57 = vmul.f32 %v1781_v50, %v1294_v55  ;;  %v1301_v58 = vmul.f32 %v1783_v56, %v1269_v51  ;;  %vm1307_vm13 = vweird.f32 %v1783_v56 }
 0x8a1   :  { %vm1308_vm15 = vmor %vm1306_vm14, %vm1307_vm13 }
 0x8a2   :  { %v1299_v24 = vsel %vm1298_vm12, %v1781_v50, %v1295_v57  ;;  %v1302_v54 = vmul.f32 %v1783_v56, %v1301_v58 }
 0x8a3   :  { %v1312_v60 = vmul.f32 %v1299_v24, %v2366_v63  ;;  %v1383_v63 = vld [vmem:[%s2490_s11 + $0x10] sm:$0xff] }
 0x8a4   :  { %v1303_v61 = vmul.f32 0.5, %v1302_v54  ;;  %1419 = vmatpush.msra.mxu0 %v1383_v63 }
 0x8a5   :  { %v1319_v0 = vmul.f32 %v2382_v31, %v1312_v60 }
 0x8a6   :  { %v1304_v1 = vsub.f32 1.5, %v1303_v61  ;;  %1420 = vmatpush.msra.mxu0 %v1382_v9 }
 0x8a7   :  { %v1326_v2 = vadd.f32 %v1705_v33, %v1319_v0 }
 0x8a8   :  { %v1305_v3 = vmul.f32 %v1783_v56, %v1304_v1  ;;  %1421 = vmatpush.msra.mxu0 %v1381_v10 }
 0x8a9   :  { %1642 = vmatmul.msk.f32.gmra.mxu3 %vm142_vm0, %v1326_v2 }
 0x8aa   :  { %v1309_v5 = vsel %vm1308_vm15, %v1783_v56, %v1305_v3 }
 0x8ab   :  { %v1313_v6 = vmul.f32 %v1309_v5, %v2372_v4  ;;  %v1706_v4 = vld [vmem:[%s2489_s10] ss:$0 sm:$0xff] }
 0x8ad   :  { %v1320_v7 = vmul.f32 %v2382_v31, %v1313_v6 }
 0x8af   :  { %v1327_v8 = vadd.f32 %v1705_v33, %v1320_v7 }
 0x8b1   :  { %1643 = vmatmul.msk.f32.gmra.mxu3 %vm142_vm0, %v1327_v8 }
 0x8de   :  { %v1365_v11 = vpop.f32.mrf.mxu3 }
 0x8df   :  { %v1366_v12 = vadd.f32 %v1706_v4, %v1365_v11  ;;  %v1708_v11 = vld [vmem:[%s2494_s15] ss:$0 sm:$0xff]  ;;  %s1940_s15 = smov [#allocation10]  }
 0x8e1   :  { %v1377_v13 = vmax.f32 %v1366_v12, 0.0 }
 0x8e3   :  { %1644 = vmatmul.msk.f32.vlgmr.msra.gmra.mxu0 %vm1393_vm1, %v1377_v13 }
 0x8e6   :  { %v1368_v14 = vpop.f32.mrf.mxu3 }
 0x8e7   :  { %v1369_v15 = vadd.f32 %v1706_v4, %v1368_v14  ;;  %v1709_v14 = vld [vmem:[%s2495_s16] ss:$0 sm:$0xff]  ;;  %s1551_s16 = sshll.u32 %s1940_s15, 4  ;;  %s1552_s16 = int_to_ptr.vmem [resolvable:$true] %s1551_s16 }
 0x8e9   :  { %v1378_v16 = vmax.f32 %v1369_v15, 0.0 }
 0x8eb   :  { %1645 = vmatmul.msk.f32.gmra.mxu0 %vm1393_vm1, %v1378_v16 }
 0x92c   :  { %v1371_v17 = vpop.f32.mrf.mxu3 }
 0x92d   :  { %v1372_v21 = vadd.f32 %v1706_v4, %v1371_v17 }
 0x92f   :  { %v1379_v59 = vmax.f32 %v1372_v21, 0.0 }
 0x931   :  { %1646 = vmatmul.msk.f32.gmra.mxu0 %vm1393_vm1, %v1379_v59 }
 0x934   :  { %v1374_v19 = vpop.f32.mrf.mxu3 }
 0x935   :  { %v1375_v27 = vadd.f32 %v1706_v4, %v1374_v19 }
 0x937   :  { %v1380_v28 = vmax.f32 %v1375_v27, 0.0 }
 0x939   :  { %1647 = vmatmul.msk.f32.gmra.mxu0 %vm1393_vm1, %v1380_v28 }
 0x960   :  { %v1423_v30 = vpop.f32.mrf.mxu0 }
 0x961   :  { %v1424_v31 = vadd.f32 %v1707_v29, %v1423_v30 }
 0x963   :  { %v1435_v23 = vadd.f32 %v1424_v31, %v2388_v36 }
 0x965   :  { %v1441_v32 = vsel %vm142_vm0, %v1435_v23, 0.0 }
 0x966   :  { %1442 = vadd.xlane.f32.xlu2 %v1441_v32 }
 0x968   :  { %v1426_v22 = vpop.f32.mrf.mxu0 }
 0x969   :  { %v1427_v33 = vadd.f32 %v1707_v29, %v1426_v22 }
 0x96b   :  { %v1436_v34 = vadd.f32 %v1427_v33, %v2393_v41 }
 0x96d   :  { %v1444_v62 = vsel %vm142_vm0, %v1436_v34, 0.0 }
 0x96e   :  { %1445 = vadd.xlane.f32.xlu0 %v1444_v62 }
 0x9ae   :  { %v1429_v35 = vpop.f32.mrf.mxu0 }
 0x9af   :  { %v1430_v38 = vadd.f32 %v1707_v29, %v1429_v35 }
 0x9b1   :  { %v1437_v43 = vadd.f32 %v1430_v38, %v1326_v2 }
 0x9b3   :  { %v1447_v39 = vsel %vm142_vm0, %v1437_v43, 0.0 }
 0x9b4   :  { %1448 = vadd.xlane.f32.xlu1 %v1447_v39 }
 0x9b6   :  { %v1432_v40 = vpop.f32.mrf.mxu0 }
 0x9b7   :  { %v1433_v42 = vadd.f32 %v1707_v29, %v1432_v40 }
 0x9b9   :  { %v1438_v44 = vadd.f32 %v1433_v42, %v1327_v8 }
 0x9bb   :  { %v1450_v36 = vsel %vm142_vm0, %v1438_v44, 0.0 }
 0x9bc   :  { %1451 = vadd.xlane.f32.xlu2 %v1450_v36 }
 0x9d9   :  { %v1443_v25 = vpop.xlane.xlu2 %1442 }
 0x9da   :  { %v1453_v45 = vmul.f32 %v1443_v25, %v2359_v37 }
 0x9dc   :  { %v1457_v46 = vsub.f32 %v1435_v23, %v1453_v45 }
 0x9de   :  { %v1461_v41 = vmul.f32 %v1457_v46, %v1457_v46 }
 0x9e0   :  { %v1465_v26 = vsel %vm142_vm0, %v1461_v41, 0.0 }
 0x9e1   :  { %v1446_v47 = vpop.xlane.xlu0 %1445  ;;  %1466 = vadd.xlane.f32.xlu0 %v1465_v26 }
 0x9e2   :  { %v1454_v48 = vmul.f32 %v1446_v47, %v2359_v37 }
 0x9e4   :  { %v1458_v49 = vsub.f32 %v1436_v34, %v1454_v48 }
 0x9e6   :  { %v1462_v50 = vmul.f32 %v1458_v49, %v1458_v49 }
 0x9e8   :  { %v1468_v51 = vsel %vm142_vm0, %v1462_v50, 0.0 }
 0x9e9   :  { %1469 = vadd.xlane.f32.xlu1 %v1468_v51 }
 0xa27   :  { %v1449_v18 = vpop.xlane.xlu1 %1448 }
 0xa28   :  { %v1455_v20 = vmul.f32 %v1449_v18, %v2359_v37 }
 0xa2a   :  { %v2446_v52 = vsub.f32 %v1437_v43, %v1455_v20 }
 0xa2c   :  { %v1463_v53 = vmul.f32 %v2446_v52, %v2446_v52 }
 0xa2e   :  { %v1471_v55 = vsel %vm142_vm0, %v1463_v53, 0.0 }
 0xa2f   :  { %1472 = vadd.xlane.f32.xlu2 %v1471_v55  ;;  %v1452_v56 = vpop.xlane.xlu2 %1451 }
 0xa30   :  { %v1456_v57 = vmul.f32 %v1452_v56, %v2359_v37 }
 0xa32   :  { %v2452_v58 = vsub.f32 %v1438_v44, %v1456_v57 }
 0xa34   :  { %v1464_v24 = vmul.f32 %v2452_v58, %v2452_v58 }
 0xa36   :  { %v1474_v54 = vsel %vm142_vm0, %v1464_v24, 0.0 }
 0xa37   :  { %1475 = vadd.xlane.f32.xlu0 %v1474_v54 }
 0xa54   :  { %v1467_v60 = vpop.xlane.xlu0 %1466 }
 0xa55   :  { %v1477_v61 = vmul.f32 %v1467_v60, %v2359_v37 }
 0xa57   :  { %v1481_v0 = vadd.f32 1e-05, %v1477_v61 }
 0xa59   :  { %1784 = vrsqrt.f32 %v1481_v0  ;;  %vm1491_vm3 = vweird.f32 %v1481_v0 }
 0xa5c   :  { %v1470_v1 = vpop.xlane.xlu1 %1469 }
 0xa5d   :  { %v1478_v2 = vmul.f32 %v1470_v1, %v2359_v37 }
 0xa5f   :  { %v1785_v3 = vpop.eup %1784  ;;  %v1482_v5 = vadd.f32 1e-05, %v1478_v2 }
 0xa60   :  { %v1486_v6 = vmul.f32 %v1785_v3, %v1481_v0  ;;  %vm1492_vm2 = vweird.f32 %v1785_v3 }
 0xa61   :  { %1786 = vrsqrt.f32 %v1482_v5  ;;  %vm1493_vm4 = vmor %vm1491_vm3, %vm1492_vm2  ;;  %vm1501_vm6 = vweird.f32 %v1482_v5 }
 0xa62   :  { %v1487_v7 = vmul.f32 %v1785_v3, %v1486_v6 }
 0xa64   :  { %v1488_v8 = vmul.f32 0.5, %v1487_v7 }
 0xa66   :  { %v1489_v63 = vsub.f32 1.5, %v1488_v8 }
 0xa67   :  { %v1787_v9 = vpop.eup %1786 }
 0xa68   :  { %v1490_v10 = vmul.f32 %v1785_v3, %v1489_v63  ;;  %v1496_v4 = vmul.f32 %v1787_v9, %v1482_v5  ;;  %vm1502_vm5 = vweird.f32 %v1787_v9 }
 0xa69   :  { %vm1503_vm7 = vmor %vm1501_vm6, %vm1502_vm5 }
 0xa6a   :  { %v1494_v12 = vsel %vm1493_vm4, %v1785_v3, %v1490_v10  ;;  %v1497_v13 = vmul.f32 %v1787_v9, %v1496_v4 }
 0xa6b   :  { %v1525_v15 = vmul.f32 %v1494_v12, %v1457_v46 }
 0xa6c   :  { %v1498_v16 = vmul.f32 0.5, %v1497_v13 }
 0xa6d   :  { %v1532_v17 = vmul.f32 %v1708_v11, %v1525_v15 }
 0xa6e   :  { %v1499_v21 = vsub.f32 1.5, %v1498_v16 }
 0xa6f   :  { %v1539_v59 = vadd.f32 %v1709_v14, %v1532_v17 }
 0xa70   :  { %v1500_v19 = vmul.f32 %v1787_v9, %v1499_v21 }
 0xa71   :  { %1543 = vst.msk [vmem:[#allocation10] sm:$0xff] %vm142_vm0, %v1539_v59 }
 0xa72   :  { %v1504_v27 = vsel %vm1503_vm7, %v1787_v9, %v1500_v19 }
 0xa73   :  { %v1526_v28 = vmul.f32 %v1504_v27, %v1458_v49 }
 0xa75   :  { %v1533_v29 = vmul.f32 %v1708_v11, %v1526_v28 }
 0xa77   :  { %v1540_v30 = vadd.f32 %v1709_v14, %v1533_v29 }
 0xa79   :  { %1544 = vst.msk [vmem:[#allocation10 + $0x8] sm:$0xff] %vm142_vm0, %v1540_v30 }
 0xaa2   :  { %v1473_v31 = vpop.xlane.xlu2 %1472 }
 0xaa3   :  { %v1479_v23 = vmul.f32 %v1473_v31, %v2359_v37 }
 0xaa5   :  { %v1483_v32 = vadd.f32 1e-05, %v1479_v23 }
 0xaa7   :  { %1788 = vrsqrt.f32 %v1483_v32  ;;  %vm1511_vm9 = vweird.f32 %v1483_v32 }
 0xaaa   :  { %v1476_v22 = vpop.xlane.xlu0 %1475 }
 0xaab   :  { %v1480_v33 = vmul.f32 %v1476_v22, %v2359_v37 }
 0xaad   :  { %v1789_v34 = vpop.eup %1788  ;;  %v1484_v62 = vadd.f32 1e-05, %v1480_v33 }
 0xaae   :  { %v1506_v35 = vmul.f32 %v1789_v34, %v1483_v32  ;;  %vm1512_vm8 = vweird.f32 %v1789_v34 }
 0xaaf   :  { %1790 = vrsqrt.f32 %v1484_v62  ;;  %vm1513_vm10 = vmor %vm1511_vm9, %vm1512_vm8  ;;  %vm1521_vm12 = vweird.f32 %v1484_v62 }
 0xab0   :  { %v1507_v38 = vmul.f32 %v1789_v34, %v1506_v35 }
 0xab2   :  { %v1508_v43 = vmul.f32 0.5, %v1507_v38 }
 0xab4   :  { %v1509_v39 = vsub.f32 1.5, %v1508_v43 }
 0xab5   :  { %v1791_v40 = vpop.eup %1790 }
 0xab6   :  { %v1510_v42 = vmul.f32 %v1789_v34, %v1509_v39  ;;  %v1516_v44 = vmul.f32 %v1791_v40, %v1484_v62  ;;  %vm1522_vm11 = vweird.f32 %v1791_v40 }
 0xab7   :  { %vm1523_vm13 = vmor %vm1521_vm12, %vm1522_vm11 }
 0xab8   :  { %v1514_v36 = vsel %vm1513_vm10, %v1789_v34, %v1510_v42  ;;  %v1517_v25 = vmul.f32 %v1791_v40, %v1516_v44 }
 0xab9   :  { %v1527_v45 = vmul.f32 %v1514_v36, %v2446_v52 }
 0xaba   :  { %v1518_v46 = vmul.f32 0.5, %v1517_v25 }
 0xabb   :  { %v1534_v41 = vmul.f32 %v1708_v11, %v1527_v45 }
 0xabc   :  { %v1519_v37 = vsub.f32 1.5, %v1518_v46 }
 0xabd   :  { %v1541_v26 = vadd.f32 %v1709_v14, %v1534_v41 }
 0xabe   :  { %v1520_v47 = vmul.f32 %v1791_v40, %v1519_v37 }
 0xabf   :  { %1545 = vst.msk [vmem:[#allocation10 + $0x10] sm:$0xff] %vm142_vm0, %v1541_v26 }
 0xac0   :  { %v1524_v48 = vsel %vm1523_vm13, %v1791_v40, %v1520_v47 }
 0xac1   :  { %v1528_v49 = vmul.f32 %v1524_v48, %v2452_v58 }
 0xac3   :  { %v1535_v50 = vmul.f32 %v1708_v11, %v1528_v49 }
 0xac5   :  { %v1542_v51 = vadd.f32 %v1709_v14, %v1535_v50 }
 0xac7   :  { %1546 = vst.msk [vmem:[#allocation10 + $0x18] sm:$0xff] %vm142_vm0, %v1542_v51 }
 0xac8   :  { %1559 = dma.vmem_to_hbm [thread:$0]  %s1552_s16, 512, %s1554_s13, [#allocation4], %s1925_s18, %s1925_s18, %s1926_s19  }
 0xac9   :  { %1922 = dma.done.wait [#allocation4], 512  }
 0xaca   :  { %1923 = vsyncadd [#allocation4], 4294966784 }
 0xacb   :  { %1564 = vsyncpa [#allocation3], 1 }
 0xacc   :  { %1565 = vsyncpa [#allocation6], 1 }
 0xacd   :  { %1566 = vsyncpa [#allocation9], 1 }
 0xace   :  { %1567 = vsyncpa [#allocation4], 1 }

</bundles_post_ra>
